<compile_context>
chip_gen: v7x
topology: tpu7x:2x2x1
jax: 0.10.0
libtpu: 0.0.40
codegen_flags: <defaults>
</compile_context>

<pallas_src>
import math

import jax
import jax.numpy as jnp
from jax.experimental import pallas as pl
from jax.experimental.pallas import tpu as pltpu


# ----------------------------- in-kernel helpers -----------------------------

def _gelu(x):
    # exact (erf) GELU, matching torch.nn.GELU() default; kept in f32
    # TODO(synk): on v5e, switch to the tanh approximation if the bundle shows
    # VALU saturation (erf lowers to a long f32 polynomial there).
    return 0.5 * x * (1.0 + jax.lax.erf(x * (1.0 / math.sqrt(2.0))))


def _layernorm(x, gamma, beta, eps):
    mu = jnp.mean(x, axis=-1, keepdims=True)
    var = jnp.mean((x - mu) ** 2, axis=-1, keepdims=True)
    return (x - mu) * jax.lax.rsqrt(var + eps) * gamma + beta


def _linear(x, w, b):
    # w is pre-transposed (in, out) and stored bf16; activations cast to the
    # weight dtype right before the MXU, accumulation in f32, bias add in f32.
    return jnp.dot(x.astype(w.dtype), w, preferred_element_type=jnp.float32) + b


# --------------------------------- the kernel --------------------------------

def _make_kernel(nhead, eps, q_tile):
    def kernel(x_ref,
               wq_ref, bq_ref, wkv_ref, bkv_ref, wo_ref, bo_ref,
               a1w1_ref, a1b1_ref, a1w2_ref, a1b2_ref,
               n1g_ref, n1b_ref,
               l1w_ref, l1b_ref, l2w_ref, l2b_ref,
               a2w1_ref, a2b1_ref, a2w2_ref, a2b2_ref,
               n2g_ref, n2b_ref,
               o_ref,
               kh_ref, vh_ref):
        S = x_ref.shape[1]            # full sequence length
        E = x_ref.shape[2]
        H = nhead
        dh = E // H
        TQ = q_tile                   # query rows handled by this grid step
        bf16 = jnp.bfloat16
        qi = pl.program_id(1)

        # ---- K/V projection + head layout: hoisted, once per batch element ----
        @pl.when(qi == 0)
        def _():
            xs = x_ref[0]                                            # (S, E) f32
            kv = jnp.dot(xs.astype(bf16), wkv_ref[...],
                         preferred_element_type=jnp.float32) + bkv_ref[...]  # (S, 2E)
            k = kv[:, :E]
            v = kv[:, E:]
            kh_ref[...] = jnp.transpose(k.reshape(S, H, dh), (1, 0, 2)).astype(bf16)
            vh_ref[...] = jnp.transpose(v.reshape(S, H, dh), (1, 0, 2)).astype(bf16)

        # ---- query slab for this step, sliced from the resident block ----
        row0 = pl.multiple_of(qi * TQ, TQ)
        xq = x_ref[0, pl.ds(row0, TQ), :]                            # (TQ, E) f32

        # Q projection; 1/sqrt(dh) already folded into wq/bq by the wrapper.
        q = _linear(xq, wq_ref[...], bq_ref[...])                    # (TQ, E) f32
        qh = jnp.transpose(q.reshape(TQ, H, dh), (1, 0, 2)).astype(bf16)  # (H,TQ,dh)

        # ---- attention ----
        # TODO(synk): for very long S, tile over keys with an online softmax so
        # the (H, TQ, S) f32 scores never materialize (flash-style).
        s = jnp.einsum("hqd,hkd->hqk", qh, kh_ref[...],
                       preferred_element_type=jnp.float32)           # (H, TQ, S)
        s = s - jnp.max(s, axis=-1, keepdims=True)
        p = jnp.exp(s)
        # approx EUP reciprocal: rows sum to 1 only to ~2^-12 relative error
        p = p * pl.reciprocal(jnp.sum(p, axis=-1, keepdims=True), approx=True)
        ctx = jnp.einsum("hqk,hkd->hqd", p.astype(bf16), vh_ref[...],
                         preferred_element_type=jnp.float32)          # (H, TQ, dh)
        attn = jnp.transpose(ctx, (1, 0, 2)).reshape(TQ, E)           # (TQ, E)

        src2 = _linear(attn, wo_ref[...], bo_ref[...])                # out_proj

        # dropout1: identity (eval).  ---- adapter1: x + W2(gelu(W1 x)) ----
        z = _gelu(_linear(src2, a1w1_ref[...], a1b1_ref[...]))
        src2 = src2 + _linear(z, a1w2_ref[...], a1b2_ref[...])

        # ---- norm1 ----
        src = _layernorm(xq + src2, n1g_ref[...], n1b_ref[...], eps)

        # ---- feed-forward (GELU) ----
        ff = _gelu(_linear(src, l1w_ref[...], l1b_ref[...]))
        src2 = _linear(ff, l2w_ref[...], l2b_ref[...])

        # dropout / dropout2: identity (eval).  ---- adapter2 ----
        z = _gelu(_linear(src2, a2w1_ref[...], a2b1_ref[...]))
        src2 = src2 + _linear(z, a2w2_ref[...], a2b2_ref[...])

        # ---- norm2 ----
        o_ref[0] = _layernorm(src + src2, n2g_ref[...], n2b_ref[...],
                              eps).astype(o_ref.dtype)

    return kernel


# --------------------------------- wrapper -----------------------------------

def _vmem_capacity_bytes():
    try:
        info = pltpu.get_tpu_info()
        cap = getattr(info, "vmem_capacity_bytes", None)
        if cap:
            return int(cap)
    except Exception:
        pass
    return 64 * 1024 * 1024   # conservative floor (v7x per-core VMEM)


def _default_q_tile(S):
    # prefer 256-row tiles (MXU M-dim occupancy on v6e/v7x), multiples of 8
    for t in (256, 128, 64, 32, 16, 8):
        if S % t == 0:
            return t
    return S


def transformer_encoder_layer(src, params, *, nhead, eps=1e-5, q_tile=None,
                              weight_dtype=jnp.bfloat16):
    """src: (S, N, E) float32, PyTorch layout (batch_first=False)."""
    S, N, E = src.shape
    assert E % nhead == 0
    dh = E // nhead
    TQ = _default_q_tile(S) if q_tile is None else int(q_tile)
    assert S % TQ == 0 and (TQ == S or TQ % 8 == 0)
    nq = S // TQ

    # NOTE: these two whole-tensor transposes are pure HBM overhead; if the
    # surrounding model can supply/consume batch-major activations they should
    # be removed (blocking the (S, N, E) layout directly would need sublane-1
    # blocks on the batch dim, which is layout-hostile).
    x = jnp.transpose(src, (1, 0, 2)).astype(jnp.float32)   # (N, S, E)

    p = params
    scale = 1.0 / math.sqrt(dh)
    wt = lambda w: jnp.transpose(w).astype(weight_dtype)    # (out,in) -> (in,out) bf16

    in_w, in_b = p["in_proj_w"], p["in_proj_b"]
    # 1/sqrt(dh) folded into the Q projection; K/V fused into one (E,2E) matmul.
    wq = jnp.transpose(in_w[0:E] * scale).astype(weight_dtype)
    bq = in_b[:, 0:E] * scale
    wkv = wt(in_w[E:3 * E])           # (E, 2E): [:, :E]=K, [:, E:]=V
    bkv = in_b[:, E:3 * E]            # (1, 2E)

    # adapters: pad hidden dim to a lane-dense multiple of 128 (exact padding:
    # padded columns give gelu(0)=0 and the padded rows of W2 are zero).
    def pad_adapter(w1, b1, w2):
        A = w1.shape[0]
        A_pad = ((A + 127) // 128) * 128
        if A_pad != A:
            w1 = jnp.pad(w1, ((0, A_pad - A), (0, 0)))
            b1 = jnp.pad(b1, ((0, 0), (0, A_pad - A)))
            w2 = jnp.pad(w2, ((0, 0), (0, A_pad - A)))
        return w1, b1, w2, A_pad

    a1w1, a1b1, a1w2, A_pad = pad_adapter(p["a1_w1"], p["a1_b1"], p["a1_w2"])
    a2w1, a2b1, a2w2, _ = pad_adapter(p["a2_w1"], p["a2_b1"], p["a2_w2"])

    weight_args = [
        wq, bq, wkv, bkv,
        wt(p["out_proj_w"]), p["out_proj_b"],
        wt(a1w1), a1b1, wt(a1w2), p["a1_b2"],
        p["n1_g"], p["n1_b"],
        wt(p["l1_w"]), p["l1_b"], wt(p["l2_w"]), p["l2_b"],
        wt(a2w1), a2b1, wt(a2w2), p["a2_b2"],
        p["n2_g"], p["n2_b"],
    ]
    F = p["l1_w"].shape[0]

    # Constant block index: the pipeline re-uses (does not re-fetch) these
    # blocks across grid steps; all params are 2-D.
    # TODO(synk): single-buffer the weight blocks (pl.Buffered(1) /
    # whole-array VMEM residency) to reclaim ~weight_bytes of VMEM on v7x.
    weight_specs = [pl.BlockSpec(w.shape, lambda n, qi: (0, 0)) for w in weight_args]

    # VMEM budget: weights (double-buffered by the pipeline), activation blocks,
    # bf16 K/V scratch and in-kernel temporaries (scores, FFN, adapters), plus
    # headroom; capped at this generation's physical VMEM.
    f32b = 4
    weight_bytes = sum(int(w.size) * w.dtype.itemsize for w in weight_args)
    act_bytes = (
        2 * f32b * S * E                    # double-buffered input block
        + 2 * f32b * TQ * E                 # double-buffered output block
        + 2 * 2 * S * E                     # bf16 K/V head scratch
        + 4 * f32b * S * E                  # hoisted KV-projection temporaries
        + nhead * TQ * S * (2 * f32b + 2)   # scores f32 + exp + bf16 probs
        + 3 * f32b * TQ * F                 # FFN activations
        + 4 * f32b * TQ * A_pad             # adapter activations
        + 12 * f32b * TQ * E                # q / attn / residual / LN temporaries
    )
    vmem_needed = 2 * weight_bytes + act_bytes + (16 << 20)
    vmem_limit = int(min(_vmem_capacity_bytes(), vmem_needed))

    out = pl.pallas_call(
        _make_kernel(nhead, eps, TQ),
        out_shape=jax.ShapeDtypeStruct((N, S, E), jnp.float32),
        grid=(N, nq),
        in_specs=[pl.BlockSpec((1, S, E), lambda n, qi: (n, 0, 0))] + weight_specs,
        out_specs=pl.BlockSpec((1, TQ, E), lambda n, qi: (n, qi, 0)),
        scratch_shapes=[pltpu.VMEM((nhead, S, dh), jnp.bfloat16),   # K heads
                        pltpu.VMEM((nhead, S, dh), jnp.bfloat16)],  # V heads
        compiler_params=pltpu.CompilerParams(
            dimension_semantics=("parallel", "arbitrary"),
            vmem_limit_bytes=vmem_limit),
    )(x, *weight_args)

    return jnp.transpose(out, (1, 0, 2))   # back to (S, N, E)


# ---------------------------- parameter construction --------------------------

def init_params(key, d_model, adapter_size, dim_feedforward):
    def nxt():
        nonlocal key
        key, sub = jax.random.split(key)
        return sub

    def lin(out_dim, in_dim):
        bound = 1.0 / math.sqrt(in_dim)
        w = jax.random.uniform(nxt(), (out_dim, in_dim), jnp.float32, -bound, bound)
        b = jax.random.uniform(nxt(), (1, out_dim), jnp.float32, -bound, bound)
        return w, b

    E, A, F = d_model, adapter_size, dim_feedforward
    in_w, in_b = lin(3 * E, E)
    ow, ob = lin(E, E)
    a1w1, a1b1 = lin(A, E)
    a1w2, a1b2 = lin(E, A)
    l1w, l1b = lin(F, E)
    l2w, l2b = lin(E, F)
    a2w1, a2b1 = lin(A, E)
    a2w2, a2b2 = lin(E, A)
    return {
        "in_proj_w": in_w, "in_proj_b": in_b,
        "out_proj_w": ow, "out_proj_b": ob,
        "a1_w1": a1w1, "a1_b1": a1b1, "a1_w2": a1w2, "a1_b2": a1b2,
        "n1_g": jnp.ones((1, E), jnp.float32), "n1_b": jnp.zeros((1, E), jnp.float32),
        "l1_w": l1w, "l1_b": l1b, "l2_w": l2w, "l2_b": l2b,
        "a2_w1": a2w1, "a2_b1": a2b1, "a2_w2": a2w2, "a2_b2": a2b2,
        "n2_g": jnp.ones((1, E), jnp.float32), "n2_b": jnp.zeros((1, E), jnp.float32),
    }


# ------------------------- pure-JAX f32 reference (check) ---------------------

def _reference(src, params, *, nhead, eps=1e-5):
    S, N, E = src.shape
    dh = E // nhead
    p = params

    def lin(x, w, b):
        return jnp.dot(x, w.T) + b[0]

    def gelu(x):
        return 0.5 * x * (1.0 + jax.lax.erf(x / math.sqrt(2.0)))

    def ln(x, g, b):
        mu = jnp.mean(x, axis=-1, keepdims=True)
        var = jnp.mean((x - mu) ** 2, axis=-1, keepdims=True)
        return (x - mu) * jax.lax.rsqrt(var + eps) * g[0] + b[0]

    def adapter(x, w1, b1, w2, b2):
        return x + lin(gelu(lin(x, w1, b1)), w2, b2)

    x = src
    qkv = lin(x, p["in_proj_w"], p["in_proj_b"])        # (S, N, 3E)
    q, k, v = jnp.split(qkv, 3, axis=-1)

    def heads(t):                                       # (S, N, E) -> (N, H, S, dh)
        return t.reshape(S, N, nhead, dh).transpose(1, 2, 0, 3)

    qh = heads(q) / math.sqrt(dh)
    kh, vh = heads(k), heads(v)
    s = jnp.einsum("nhqd,nhkd->nhqk", qh, kh)
    a = jax.nn.softmax(s, axis=-1)
    ctx = jnp.einsum("nhqk,nhkd->nhqd", a, vh)          # (N, H, S, dh)
    attn = ctx.transpose(2, 0, 1, 3).reshape(S, N, E)
    src2 = lin(attn, p["out_proj_w"], p["out_proj_b"])

    src2 = adapter(src2, p["a1_w1"], p["a1_b1"], p["a1_w2"], p["a1_b2"])
    y = ln(x + src2, p["n1_g"], p["n1_b"])
    src2 = lin(gelu(lin(y, p["l1_w"], p["l1_b"])), p["l2_w"], p["l2_b"])
    src2 = adapter(src2, p["a2_w1"], p["a2_b1"], p["a2_w2"], p["a2_b2"])
    return ln(y + src2, p["n2_g"], p["n2_b"])


if __name__ == "__main__":
    S, N, E = 16, 2, 128        # seq, batch, d_model (lane-dense last dim)
    nhead = 4
    adapter_size = 64           # padded to 128 inside the wrapper
    dim_feedforward = 256       # (PyTorch default 3072; shrunk for a small test)

    key = jax.random.PRNGKey(0)
    key, kx = jax.random.split(key)
    src = jax.random.normal(kx, (S, N, E), jnp.float32)
    params = init_params(key, E, adapter_size, dim_feedforward)

    # q_tile=8 -> two query tiles per batch element, exercising the hoisted
    # (once-per-batch) K/V projection path.
    out = transformer_encoder_layer(src, params, nhead=nhead, eps=1e-5, q_tile=8)
    out = jax.block_until_ready(out)
    assert out.shape == (S, N, E) and out.dtype == jnp.float32
    assert bool(jnp.all(jnp.isfinite(out)))

    # loose check vs f32 reference (kernel uses bf16 MXU inputs + approx recip)
    ref = _reference(src, params, nhead=nhead, eps=1e-5)
    err = float(jnp.max(jnp.abs(out - ref)))
    assert err < 0.2, f"max abs error vs reference too large: {err}"

    print("KERNEL_OK")
</pallas_src>

<mosaic_0001>
module attributes {stable_mosaic.version = 11 : i64} {
  func.func @kernel(%arg0: i32, %arg1: i32, %arg2: memref<1x16x128xf32, #tpu.memory_space<vmem>>, %arg3: memref<128x128xbf16, #tpu.memory_space<vmem>>, %arg4: memref<1x128xf32, #tpu.memory_space<vmem>>, %arg5: memref<128x256xbf16, #tpu.memory_space<vmem>>, %arg6: memref<1x256xf32, #tpu.memory_space<vmem>>, %arg7: memref<128x128xbf16, #tpu.memory_space<vmem>>, %arg8: memref<1x128xf32, #tpu.memory_space<vmem>>, %arg9: memref<128x128xbf16, #tpu.memory_space<vmem>>, %arg10: memref<1x128xf32, #tpu.memory_space<vmem>>, %arg11: memref<128x128xbf16, #tpu.memory_space<vmem>>, %arg12: memref<1x128xf32, #tpu.memory_space<vmem>>, %arg13: memref<1x128xf32, #tpu.memory_space<vmem>>, %arg14: memref<1x128xf32, #tpu.memory_space<vmem>>, %arg15: memref<128x256xbf16, #tpu.memory_space<vmem>>, %arg16: memref<1x256xf32, #tpu.memory_space<vmem>>, %arg17: memref<256x128xbf16, #tpu.memory_space<vmem>>, %arg18: memref<1x128xf32, #tpu.memory_space<vmem>>, %arg19: memref<128x128xbf16, #tpu.memory_space<vmem>>, %arg20: memref<1x128xf32, #tpu.memory_space<vmem>>, %arg21: memref<128x128xbf16, #tpu.memory_space<vmem>>, %arg22: memref<1x128xf32, #tpu.memory_space<vmem>>, %arg23: memref<1x128xf32, #tpu.memory_space<vmem>>, %arg24: memref<1x128xf32, #tpu.memory_space<vmem>>, %arg25: memref<1x8x128xf32, #tpu.memory_space<vmem>>, %arg26: memref<4x16x32xbf16, #tpu.memory_space<vmem>>, %arg27: memref<4x16x32xbf16, #tpu.memory_space<vmem>>) attributes {dimension_semantics = [#tpu.dimension_semantics<parallel>, #tpu.dimension_semantics<arbitrary>], iteration_bounds = array<i64: 2, 2>, scalar_prefetch = 0 : i64, scratch_operands = 2 : i64, tpu.core_type = #tpu.core_type<tc>, window_params = [{transform_indices = @transform_0, window_bounds = array<i64: 1, 16, 128>}, {pipeline_mode = #tpu.pipeline_mode<synchronous>, transform_indices = @transform_1, window_bounds = array<i64: 128, 128>}, {pipeline_mode = #tpu.pipeline_mode<synchronous>, transform_indices = @transform_2, window_bounds = array<i64: 1, 128>}, {pipeline_mode = #tpu.pipeline_mode<synchronous>, transform_indices = @transform_3, window_bounds = array<i64: 128, 256>}, {pipeline_mode = #tpu.pipeline_mode<synchronous>, transform_indices = @transform_4, window_bounds = array<i64: 1, 256>}, {pipeline_mode = #tpu.pipeline_mode<synchronous>, transform_indices = @transform_5, window_bounds = array<i64: 128, 128>}, {pipeline_mode = #tpu.pipeline_mode<synchronous>, transform_indices = @transform_6, window_bounds = array<i64: 1, 128>}, {pipeline_mode = #tpu.pipeline_mode<synchronous>, transform_indices = @transform_7, window_bounds = array<i64: 128, 128>}, {pipeline_mode = #tpu.pipeline_mode<synchronous>, transform_indices = @transform_8, window_bounds = array<i64: 1, 128>}, {pipeline_mode = #tpu.pipeline_mode<synchronous>, transform_indices = @transform_9, window_bounds = array<i64: 128, 128>}, {pipeline_mode = #tpu.pipeline_mode<synchronous>, transform_indices = @transform_10, window_bounds = array<i64: 1, 128>}, {pipeline_mode = #tpu.pipeline_mode<synchronous>, transform_indices = @transform_11, window_bounds = array<i64: 1, 128>}, {pipeline_mode = #tpu.pipeline_mode<synchronous>, transform_indices = @transform_12, window_bounds = array<i64: 1, 128>}, {pipeline_mode = #tpu.pipeline_mode<synchronous>, transform_indices = @transform_13, window_bounds = array<i64: 128, 256>}, {pipeline_mode = #tpu.pipeline_mode<synchronous>, transform_indices = @transform_14, window_bounds = array<i64: 1, 256>}, {pipeline_mode = #tpu.pipeline_mode<synchronous>, transform_indices = @transform_15, window_bounds = array<i64: 256, 128>}, {pipeline_mode = #tpu.pipeline_mode<synchronous>, transform_indices = @transform_16, window_bounds = array<i64: 1, 128>}, {pipeline_mode = #tpu.pipeline_mode<synchronous>, transform_indices = @transform_17, window_bounds = array<i64: 128, 128>}, {pipeline_mode = #tpu.pipeline_mode<synchronous>, transform_indices = @transform_18, window_bounds = array<i64: 1, 128>}, {pipeline_mode = #tpu.pipeline_mode<synchronous>, transform_indices = @transform_19, window_bounds = array<i64: 128, 128>}, {pipeline_mode = #tpu.pipeline_mode<synchronous>, transform_indices = @transform_20, window_bounds = array<i64: 1, 128>}, {pipeline_mode = #tpu.pipeline_mode<synchronous>, transform_indices = @transform_21, window_bounds = array<i64: 1, 128>}, {pipeline_mode = #tpu.pipeline_mode<synchronous>, transform_indices = @transform_22, window_bounds = array<i64: 1, 128>}, {transform_indices = @transform_23, window_bounds = array<i64: 1, 8, 128>}]} {
    %c0_i32 = arith.constant 0 : i32
    %0 = arith.cmpi eq, %arg1, %c0_i32 : i32
    %1 = arith.extui %0 : i1 to i32
    %c0_i32_0 = arith.constant 0 : i32
    %2 = arith.cmpi ne, %1, %c0_i32_0 : i32
    scf.if %2 {
      %c0_81 = arith.constant 0 : index
      %c0_82 = arith.constant 0 : index
      %c0_83 = arith.constant 0 : index
      %155 = vector.load %arg2[%c0_81, %c0_82, %c0_83] : memref<1x16x128xf32, #tpu.memory_space<vmem>>, vector<1x16x128xf32>
      %156 = vector.shape_cast %155 : vector<1x16x128xf32> to vector<16x128xf32>
      %157 = arith.truncf %156 : vector<16x128xf32> to vector<16x128xbf16>
      %c0_84 = arith.constant 0 : index
      %c0_85 = arith.constant 0 : index
      %158 = vector.load %arg5[%c0_84, %c0_85] : memref<128x256xbf16, #tpu.memory_space<vmem>>, vector<128x256xbf16>
      %cst_86 = arith.constant dense<0.000000e+00> : vector<16x256xf32>
      %159 = tpu.matmul %157, %158, %cst_86 {dimension_numbers = #tpu.dot_dimension_numbers<[1], [0], [0], [1], [0, 0, 1, 1], [], []>} : vector<16x128xbf16>, vector<128x256xbf16>, vector<16x256xf32> -> vector<16x256xf32>
      %c0_87 = arith.constant 0 : index
      %c0_88 = arith.constant 0 : index
      %160 = vector.load %arg6[%c0_87, %c0_88] : memref<1x256xf32, #tpu.memory_space<vmem>>, vector<1x256xf32>
      %161 = vector.broadcast %160 : vector<1x256xf32> to vector<16x256xf32>
      %162 = arith.addf %159, %161 : vector<16x256xf32>
      %163 = vector.extract_strided_slice %162 {offsets = [0, 0], sizes = [16, 128], strides = [1, 1]} : vector<16x256xf32> to vector<16x128xf32>
      %164 = vector.extract_strided_slice %162 {offsets = [0, 128], sizes = [16, 128], strides = [1, 1]} : vector<16x256xf32> to vector<16x128xf32>
      %165 = vector.shape_cast %163 : vector<16x128xf32> to vector<16x4x32xf32>
      %166 = tpu.transpose %165, [1, 0, 2] : vector<16x4x32xf32> -> vector<4x16x32xf32>
      %167 = arith.truncf %166 : vector<4x16x32xf32> to vector<4x16x32xbf16>
      %c0_89 = arith.constant 0 : index
      %c0_90 = arith.constant 0 : index
      %c0_91 = arith.constant 0 : index
      %168 = vector.load %arg26[%c0_89, %c0_90, %c0_91] : memref<4x16x32xbf16, #tpu.memory_space<vmem>>, vector<4x16x32xbf16>
      tpu.vector_store %arg26[%c0_89, %c0_90, %c0_91], %167 {strides = array<i32>} : memref<4x16x32xbf16, #tpu.memory_space<vmem>>, vector<4x16x32xbf16>,
      %169 = vector.shape_cast %164 : vector<16x128xf32> to vector<16x4x32xf32>
      %170 = tpu.transpose %169, [1, 0, 2] : vector<16x4x32xf32> -> vector<4x16x32xf32>
      %171 = arith.truncf %170 : vector<4x16x32xf32> to vector<4x16x32xbf16>
      %c0_92 = arith.constant 0 : index
      %c0_93 = arith.constant 0 : index
      %c0_94 = arith.constant 0 : index
      %172 = vector.load %arg27[%c0_92, %c0_93, %c0_94] : memref<4x16x32xbf16, #tpu.memory_space<vmem>>, vector<4x16x32xbf16>
      tpu.vector_store %arg27[%c0_92, %c0_93, %c0_94], %171 {strides = array<i32>} : memref<4x16x32xbf16, #tpu.memory_space<vmem>>, vector<4x16x32xbf16>,
    } else {
    }
    %c8_i32 = arith.constant 8 : i32
    %3 = arith.muli %arg1, %c8_i32 : i32
    %4 = tpu.assume_multiple %3, 8 : i32
    %c0 = arith.constant 0 : index
    %5 = arith.index_cast %4 : i32 to index
    %c0_1 = arith.constant 0 : index
    %6 = vector.load %arg2[%c0, %5, %c0_1] : memref<1x16x128xf32, #tpu.memory_space<vmem>>, vector<1x8x128xf32>
    %7 = vector.shape_cast %6 : vector<1x8x128xf32> to vector<8x128xf32>
    %c0_2 = arith.constant 0 : index
    %c0_3 = arith.constant 0 : index
    %8 = vector.load %arg3[%c0_2, %c0_3] : memref<128x128xbf16, #tpu.memory_space<vmem>>, vector<128x128xbf16>
    %c0_4 = arith.constant 0 : index
    %c0_5 = arith.constant 0 : index
    %9 = vector.load %arg4[%c0_4, %c0_5] : memref<1x128xf32, #tpu.memory_space<vmem>>, vector<1x128xf32>
    %10 = arith.truncf %7 : vector<8x128xf32> to vector<8x128xbf16>
    %cst = arith.constant dense<0.000000e+00> : vector<8x128xf32>
    %11 = tpu.matmul %10, %8, %cst {dimension_numbers = #tpu.dot_dimension_numbers<[1], [0], [0], [1], [0, 0, 1, 1], [], []>} : vector<8x128xbf16>, vector<128x128xbf16>, vector<8x128xf32> -> vector<8x128xf32>
    %12 = vector.broadcast %9 : vector<1x128xf32> to vector<8x128xf32>
    %13 = arith.addf %11, %12 : vector<8x128xf32>
    %14 = vector.shape_cast %13 : vector<8x128xf32> to vector<8x4x32xf32>
    %15 = tpu.transpose %14, [1, 0, 2] : vector<8x4x32xf32> -> vector<4x8x32xf32>
    %16 = arith.truncf %15 : vector<4x8x32xf32> to vector<4x8x32xbf16>
    %c0_6 = arith.constant 0 : index
    %c0_7 = arith.constant 0 : index
    %c0_8 = arith.constant 0 : index
    %17 = vector.load %arg26[%c0_6, %c0_7, %c0_8] : memref<4x16x32xbf16, #tpu.memory_space<vmem>>, vector<4x16x32xbf16>
    "tpu.trace_start"() <{level = 10 : i32, message = "hqd,hkd->hqk"}> : () -> ()
    %cst_9 = arith.constant dense<0.000000e+00> : vector<4x8x16xf32>
    %18 = tpu.matmul %16, %17, %cst_9 {dimension_numbers = #tpu.dot_dimension_numbers<[2], [2], [1], [1], [0, 0, 0, 1, 1, 1], [0], [0]>} : vector<4x8x32xbf16>, vector<4x16x32xbf16>, vector<4x8x16xf32> -> vector<4x8x16xf32>
    "tpu.trace_stop"() : () -> ()
    %cst_10 = arith.constant dense<0xFF800000> : vector<4x8xf32>
    %19 = vector.multi_reduction <maximumf>, %18, %cst_10 [2] : vector<4x8x16xf32> to vector<4x8xf32>
    %20 = vector.shape_cast %19 : vector<4x8xf32> to vector<4x8x1xf32>
    %21 = vector.broadcast %20 : vector<4x8x1xf32> to vector<4x8x16xf32>
    %22 = arith.subf %18, %21 : vector<4x8x16xf32>
    %23 = math.exp %22 : vector<4x8x16xf32>
    %cst_11 = arith.constant dense<0.000000e+00> : vector<4x8xf32>
    %24 = vector.multi_reduction <add>, %23, %cst_11 [2] : vector<4x8x16xf32> to vector<4x8xf32>
    %25 = vector.shape_cast %24 : vector<4x8xf32> to vector<4x8x1xf32>
    %26 = tpu.reciprocal %25 {approx = true} : vector<4x8x1xf32> -> vector<4x8x1xf32>
    %27 = vector.broadcast %26 : vector<4x8x1xf32> to vector<4x8x16xf32>
    %28 = arith.mulf %23, %27 : vector<4x8x16xf32>
    %29 = arith.truncf %28 : vector<4x8x16xf32> to vector<4x8x16xbf16>
    %c0_12 = arith.constant 0 : index
    %c0_13 = arith.constant 0 : index
    %c0_14 = arith.constant 0 : index
    %30 = vector.load %arg27[%c0_12, %c0_13, %c0_14] : memref<4x16x32xbf16, #tpu.memory_space<vmem>>, vector<4x16x32xbf16>
    "tpu.trace_start"() <{level = 10 : i32, message = "hqk,hkd->hqd"}> : () -> ()
    %cst_15 = arith.constant dense<0.000000e+00> : vector<4x8x32xf32>
    %31 = tpu.matmul %29, %30, %cst_15 {dimension_numbers = #tpu.dot_dimension_numbers<[2], [1], [1], [2], [0, 0, 0, 1, 1, 2], [0], [0]>} : vector<4x8x16xbf16>, vector<4x16x32xbf16>, vector<4x8x32xf32> -> vector<4x8x32xf32>
    "tpu.trace_stop"() : () -> ()
    %32 = tpu.transpose %31, [1, 0, 2] : vector<4x8x32xf32> -> vector<8x4x32xf32>
    %33 = vector.shape_cast %32 : vector<8x4x32xf32> to vector<8x128xf32>
    %c0_16 = arith.constant 0 : index
    %c0_17 = arith.constant 0 : index
    %34 = vector.load %arg7[%c0_16, %c0_17] : memref<128x128xbf16, #tpu.memory_space<vmem>>, vector<128x128xbf16>
    %c0_18 = arith.constant 0 : index
    %c0_19 = arith.constant 0 : index
    %35 = vector.load %arg8[%c0_18, %c0_19] : memref<1x128xf32, #tpu.memory_space<vmem>>, vector<1x128xf32>
    %36 = arith.truncf %33 : vector<8x128xf32> to vector<8x128xbf16>
    %cst_20 = arith.constant dense<0.000000e+00> : vector<8x128xf32>
    %37 = tpu.matmul %36, %34, %cst_20 {dimension_numbers = #tpu.dot_dimension_numbers<[1], [0], [0], [1], [0, 0, 1, 1], [], []>} : vector<8x128xbf16>, vector<128x128xbf16>, vector<8x128xf32> -> vector<8x128xf32>
    %38 = vector.broadcast %35 : vector<1x128xf32> to vector<8x128xf32>
    %39 = arith.addf %37, %38 : vector<8x128xf32>
    %c0_21 = arith.constant 0 : index
    %c0_22 = arith.constant 0 : index
    %40 = vector.load %arg9[%c0_21, %c0_22] : memref<128x128xbf16, #tpu.memory_space<vmem>>, vector<128x128xbf16>
    %c0_23 = arith.constant 0 : index
    %c0_24 = arith.constant 0 : index
    %41 = vector.load %arg10[%c0_23, %c0_24] : memref<1x128xf32, #tpu.memory_space<vmem>>, vector<1x128xf32>
    %42 = arith.truncf %39 : vector<8x128xf32> to vector<8x128xbf16>
    %cst_25 = arith.constant dense<0.000000e+00> : vector<8x128xf32>
    %43 = tpu.matmul %42, %40, %cst_25 {dimension_numbers = #tpu.dot_dimension_numbers<[1], [0], [0], [1], [0, 0, 1, 1], [], []>} : vector<8x128xbf16>, vector<128x128xbf16>, vector<8x128xf32> -> vector<8x128xf32>
    %44 = vector.broadcast %41 : vector<1x128xf32> to vector<8x128xf32>
    %45 = arith.addf %43, %44 : vector<8x128xf32>
    %cst_26 = arith.constant 5.000000e-01 : f32
    %46 = vector.broadcast %cst_26 : f32 to vector<8x128xf32>
    %47 = arith.mulf %46, %45 : vector<8x128xf32>
    %cst_27 = arith.constant 0.707106769 : f32
    %48 = vector.broadcast %cst_27 : f32 to vector<8x128xf32>
    %49 = arith.mulf %45, %48 : vector<8x128xf32>
    %50 = math.erf %49 : vector<8x128xf32>
    %cst_28 = arith.constant 1.000000e+00 : f32
    %51 = vector.broadcast %cst_28 : f32 to vector<8x128xf32>
    %52 = arith.addf %51, %50 : vector<8x128xf32>
    %53 = arith.mulf %47, %52 : vector<8x128xf32>
    %c0_29 = arith.constant 0 : index
    %c0_30 = arith.constant 0 : index
    %54 = vector.load %arg11[%c0_29, %c0_30] : memref<128x128xbf16, #tpu.memory_space<vmem>>, vector<128x128xbf16>
    %c0_31 = arith.constant 0 : index
    %c0_32 = arith.constant 0 : index
    %55 = vector.load %arg12[%c0_31, %c0_32] : memref<1x128xf32, #tpu.memory_space<vmem>>, vector<1x128xf32>
    %56 = arith.truncf %53 : vector<8x128xf32> to vector<8x128xbf16>
    %cst_33 = arith.constant dense<0.000000e+00> : vector<8x128xf32>
    %57 = tpu.matmul %56, %54, %cst_33 {dimension_numbers = #tpu.dot_dimension_numbers<[1], [0], [0], [1], [0, 0, 1, 1], [], []>} : vector<8x128xbf16>, vector<128x128xbf16>, vector<8x128xf32> -> vector<8x128xf32>
    %58 = vector.broadcast %55 : vector<1x128xf32> to vector<8x128xf32>
    %59 = arith.addf %57, %58 : vector<8x128xf32>
    %60 = arith.addf %39, %59 : vector<8x128xf32>
    %61 = arith.addf %7, %60 : vector<8x128xf32>
    %c0_34 = arith.constant 0 : index
    %c0_35 = arith.constant 0 : index
    %62 = vector.load %arg13[%c0_34, %c0_35] : memref<1x128xf32, #tpu.memory_space<vmem>>, vector<1x128xf32>
    %c0_36 = arith.constant 0 : index
    %c0_37 = arith.constant 0 : index
    %63 = vector.load %arg14[%c0_36, %c0_37] : memref<1x128xf32, #tpu.memory_space<vmem>>, vector<1x128xf32>
    %cst_38 = arith.constant dense<0.000000e+00> : vector<8xf32>
    %64 = vector.multi_reduction <add>, %61, %cst_38 [1] : vector<8x128xf32> to vector<8xf32>
    %65 = vector.shape_cast %64 : vector<8xf32> to vector<8x1xf32>
    %cst_39 = arith.constant 1.280000e+02 : f32
    %66 = vector.broadcast %cst_39 : f32 to vector<8x1xf32>
    %67 = arith.divf %65, %66 : vector<8x1xf32>
    %68 = vector.broadcast %67 : vector<8x1xf32> to vector<8x128xf32>
    %69 = arith.subf %61, %68 : vector<8x128xf32>
    %70 = arith.mulf %69, %69 : vector<8x128xf32>
    %cst_40 = arith.constant dense<0.000000e+00> : vector<8xf32>
    %71 = vector.multi_reduction <add>, %70, %cst_40 [1] : vector<8x128xf32> to vector<8xf32>
    %72 = vector.shape_cast %71 : vector<8xf32> to vector<8x1xf32>
    %cst_41 = arith.constant 1.280000e+02 : f32
    %73 = vector.broadcast %cst_41 : f32 to vector<8x1xf32>
    %74 = arith.divf %72, %73 : vector<8x1xf32>
    %75 = vector.broadcast %67 : vector<8x1xf32> to vector<8x128xf32>
    %76 = arith.subf %61, %75 : vector<8x128xf32>
    %cst_42 = arith.constant 9.99999974E-6 : f32
    %77 = vector.broadcast %cst_42 : f32 to vector<8x1xf32>
    %78 = arith.addf %74, %77 : vector<8x1xf32>
    %79 = math.rsqrt %78 : vector<8x1xf32>
    %80 = vector.broadcast %79 : vector<8x1xf32> to vector<8x128xf32>
    %81 = arith.mulf %76, %80 : vector<8x128xf32>
    %82 = vector.broadcast %62 : vector<1x128xf32> to vector<8x128xf32>
    %83 = arith.mulf %81, %82 : vector<8x128xf32>
    %84 = vector.broadcast %63 : vector<1x128xf32> to vector<8x128xf32>
    %85 = arith.addf %83, %84 : vector<8x128xf32>
    %c0_43 = arith.constant 0 : index
    %c0_44 = arith.constant 0 : index
    %86 = vector.load %arg15[%c0_43, %c0_44] : memref<128x256xbf16, #tpu.memory_space<vmem>>, vector<128x256xbf16>
    %c0_45 = arith.constant 0 : index
    %c0_46 = arith.constant 0 : index
    %87 = vector.load %arg16[%c0_45, %c0_46] : memref<1x256xf32, #tpu.memory_space<vmem>>, vector<1x256xf32>
    %88 = arith.truncf %85 : vector<8x128xf32> to vector<8x128xbf16>
    %cst_47 = arith.constant dense<0.000000e+00> : vector<8x256xf32>
    %89 = tpu.matmul %88, %86, %cst_47 {dimension_numbers = #tpu.dot_dimension_numbers<[1], [0], [0], [1], [0, 0, 1, 1], [], []>} : vector<8x128xbf16>, vector<128x256xbf16>, vector<8x256xf32> -> vector<8x256xf32>
    %90 = vector.broadcast %87 : vector<1x256xf32> to vector<8x256xf32>
    %91 = arith.addf %89, %90 : vector<8x256xf32>
    %cst_48 = arith.constant 5.000000e-01 : f32
    %92 = vector.broadcast %cst_48 : f32 to vector<8x256xf32>
    %93 = arith.mulf %92, %91 : vector<8x256xf32>
    %cst_49 = arith.constant 0.707106769 : f32
    %94 = vector.broadcast %cst_49 : f32 to vector<8x256xf32>
    %95 = arith.mulf %91, %94 : vector<8x256xf32>
    %96 = math.erf %95 : vector<8x256xf32>
    %cst_50 = arith.constant 1.000000e+00 : f32
    %97 = vector.broadcast %cst_50 : f32 to vector<8x256xf32>
    %98 = arith.addf %97, %96 : vector<8x256xf32>
    %99 = arith.mulf %93, %98 : vector<8x256xf32>
    %c0_51 = arith.constant 0 : index
    %c0_52 = arith.constant 0 : index
    %100 = vector.load %arg17[%c0_51, %c0_52] : memref<256x128xbf16, #tpu.memory_space<vmem>>, vector<256x128xbf16>
    %c0_53 = arith.constant 0 : index
    %c0_54 = arith.constant 0 : index
    %101 = vector.load %arg18[%c0_53, %c0_54] : memref<1x128xf32, #tpu.memory_space<vmem>>, vector<1x128xf32>
    %102 = arith.truncf %99 : vector<8x256xf32> to vector<8x256xbf16>
    %cst_55 = arith.constant dense<0.000000e+00> : vector<8x128xf32>
    %103 = tpu.matmul %102, %100, %cst_55 {dimension_numbers = #tpu.dot_dimension_numbers<[1], [0], [0], [1], [0, 0, 1, 1], [], []>} : vector<8x256xbf16>, vector<256x128xbf16>, vector<8x128xf32> -> vector<8x128xf32>
    %104 = vector.broadcast %101 : vector<1x128xf32> to vector<8x128xf32>
    %105 = arith.addf %103, %104 : vector<8x128xf32>
    %c0_56 = arith.constant 0 : index
    %c0_57 = arith.constant 0 : index
    %106 = vector.load %arg19[%c0_56, %c0_57] : memref<128x128xbf16, #tpu.memory_space<vmem>>, vector<128x128xbf16>
    %c0_58 = arith.constant 0 : index
    %c0_59 = arith.constant 0 : index
    %107 = vector.load %arg20[%c0_58, %c0_59] : memref<1x128xf32, #tpu.memory_space<vmem>>, vector<1x128xf32>
    %108 = arith.truncf %105 : vector<8x128xf32> to vector<8x128xbf16>
    %cst_60 = arith.constant dense<0.000000e+00> : vector<8x128xf32>
    %109 = tpu.matmul %108, %106, %cst_60 {dimension_numbers = #tpu.dot_dimension_numbers<[1], [0], [0], [1], [0, 0, 1, 1], [], []>} : vector<8x128xbf16>, vector<128x128xbf16>, vector<8x128xf32> -> vector<8x128xf32>
    %110 = vector.broadcast %107 : vector<1x128xf32> to vector<8x128xf32>
    %111 = arith.addf %109, %110 : vector<8x128xf32>
    %cst_61 = arith.constant 5.000000e-01 : f32
    %112 = vector.broadcast %cst_61 : f32 to vector<8x128xf32>
    %113 = arith.mulf %112, %111 : vector<8x128xf32>
    %cst_62 = arith.constant 0.707106769 : f32
    %114 = vector.broadcast %cst_62 : f32 to vector<8x128xf32>
    %115 = arith.mulf %111, %114 : vector<8x128xf32>
    %116 = math.erf %115 : vector<8x128xf32>
    %cst_63 = arith.constant 1.000000e+00 : f32
    %117 = vector.broadcast %cst_63 : f32 to vector<8x128xf32>
    %118 = arith.addf %117, %116 : vector<8x128xf32>
    %119 = arith.mulf %113, %118 : vector<8x128xf32>
    %c0_64 = arith.constant 0 : index
    %c0_65 = arith.constant 0 : index
    %120 = vector.load %arg21[%c0_64, %c0_65] : memref<128x128xbf16, #tpu.memory_space<vmem>>, vector<128x128xbf16>
    %c0_66 = arith.constant 0 : index
    %c0_67 = arith.constant 0 : index
    %121 = vector.load %arg22[%c0_66, %c0_67] : memref<1x128xf32, #tpu.memory_space<vmem>>, vector<1x128xf32>
    %122 = arith.truncf %119 : vector<8x128xf32> to vector<8x128xbf16>
    %cst_68 = arith.constant dense<0.000000e+00> : vector<8x128xf32>
    %123 = tpu.matmul %122, %120, %cst_68 {dimension_numbers = #tpu.dot_dimension_numbers<[1], [0], [0], [1], [0, 0, 1, 1], [], []>} : vector<8x128xbf16>, vector<128x128xbf16>, vector<8x128xf32> -> vector<8x128xf32>
    %124 = vector.broadcast %121 : vector<1x128xf32> to vector<8x128xf32>
    %125 = arith.addf %123, %124 : vector<8x128xf32>
    %126 = arith.addf %105, %125 : vector<8x128xf32>
    %127 = arith.addf %85, %126 : vector<8x128xf32>
    %c0_69 = arith.constant 0 : index
    %c0_70 = arith.constant 0 : index
    %128 = vector.load %arg23[%c0_69, %c0_70] : memref<1x128xf32, #tpu.memory_space<vmem>>, vector<1x128xf32>
    %c0_71 = arith.constant 0 : index
    %c0_72 = arith.constant 0 : index
    %129 = vector.load %arg24[%c0_71, %c0_72] : memref<1x128xf32, #tpu.memory_space<vmem>>, vector<1x128xf32>
    %cst_73 = arith.constant dense<0.000000e+00> : vector<8xf32>
    %130 = vector.multi_reduction <add>, %127, %cst_73 [1] : vector<8x128xf32> to vector<8xf32>
    %131 = vector.shape_cast %130 : vector<8xf32> to vector<8x1xf32>
    %cst_74 = arith.constant 1.280000e+02 : f32
    %132 = vector.broadcast %cst_74 : f32 to vector<8x1xf32>
    %133 = arith.divf %131, %132 : vector<8x1xf32>
    %134 = vector.broadcast %133 : vector<8x1xf32> to vector<8x128xf32>
    %135 = arith.subf %127, %134 : vector<8x128xf32>
    %136 = arith.mulf %135, %135 : vector<8x128xf32>
    %cst_75 = arith.constant dense<0.000000e+00> : vector<8xf32>
    %137 = vector.multi_reduction <add>, %136, %cst_75 [1] : vector<8x128xf32> to vector<8xf32>
    %138 = vector.shape_cast %137 : vector<8xf32> to vector<8x1xf32>
    %cst_76 = arith.constant 1.280000e+02 : f32
    %139 = vector.broadcast %cst_76 : f32 to vector<8x1xf32>
    %140 = arith.divf %138, %139 : vector<8x1xf32>
    %141 = vector.broadcast %133 : vector<8x1xf32> to vector<8x128xf32>
    %142 = arith.subf %127, %141 : vector<8x128xf32>
    %cst_77 = arith.constant 9.99999974E-6 : f32
    %143 = vector.broadcast %cst_77 : f32 to vector<8x1xf32>
    %144 = arith.addf %140, %143 : vector<8x1xf32>
    %145 = math.rsqrt %144 : vector<8x1xf32>
    %146 = vector.broadcast %145 : vector<8x1xf32> to vector<8x128xf32>
    %147 = arith.mulf %142, %146 : vector<8x128xf32>
    %148 = vector.broadcast %128 : vector<1x128xf32> to vector<8x128xf32>
    %149 = arith.mulf %147, %148 : vector<8x128xf32>
    %150 = vector.broadcast %129 : vector<1x128xf32> to vector<8x128xf32>
    %151 = arith.addf %149, %150 : vector<8x128xf32>
    %c0_78 = arith.constant 0 : index
    %c0_79 = arith.constant 0 : index
    %c0_80 = arith.constant 0 : index
    %152 = vector.load %arg25[%c0_78, %c0_79, %c0_80] : memref<1x8x128xf32, #tpu.memory_space<vmem>>, vector<1x8x128xf32>
    %153 = vector.shape_cast %152 : vector<1x8x128xf32> to vector<8x128xf32>
    %154 = vector.shape_cast %151 : vector<8x128xf32> to vector<1x8x128xf32>
    tpu.vector_store %arg25[%c0_78, %c0_79, %c0_80], %154 {strides = array<i32>} : memref<1x8x128xf32, #tpu.memory_space<vmem>>, vector<1x8x128xf32>,
    return
  }
  func.func @transform_0(%arg0: i32, %arg1: i32) -> (i32, i32, i32) {
    %c0_i32 = arith.constant 0 : i32
    %c0_i32_0 = arith.constant 0 : i32
    %c0_i32_1 = arith.constant 0 : i32
    return %arg0, %c0_i32, %c0_i32_0 : i32, i32, i32
  }
  func.func @transform_1(%arg0: i32, %arg1: i32) -> (i32, i32) {
    %c0_i32 = arith.constant 0 : i32
    %c0_i32_0 = arith.constant 0 : i32
    %c0_i32_1 = arith.constant 0 : i32
    return %c0_i32, %c0_i32_0 : i32, i32
  }
  func.func @transform_2(%arg0: i32, %arg1: i32) -> (i32, i32) {
    %c0_i32 = arith.constant 0 : i32
    %c0_i32_0 = arith.constant 0 : i32
    %c0_i32_1 = arith.constant 0 : i32
    return %c0_i32, %c0_i32_0 : i32, i32
  }
  func.func @transform_3(%arg0: i32, %arg1: i32) -> (i32, i32) {
    %c0_i32 = arith.constant 0 : i32
    %c0_i32_0 = arith.constant 0 : i32
    %c0_i32_1 = arith.constant 0 : i32
    return %c0_i32, %c0_i32_0 : i32, i32
  }
  func.func @transform_4(%arg0: i32, %arg1: i32) -> (i32, i32) {
    %c0_i32 = arith.constant 0 : i32
    %c0_i32_0 = arith.constant 0 : i32
    %c0_i32_1 = arith.constant 0 : i32
    return %c0_i32, %c0_i32_0 : i32, i32
  }
  func.func @transform_5(%arg0: i32, %arg1: i32) -> (i32, i32) {
    %c0_i32 = arith.constant 0 : i32
    %c0_i32_0 = arith.constant 0 : i32
    %c0_i32_1 = arith.constant 0 : i32
    return %c0_i32, %c0_i32_0 : i32, i32
  }
  func.func @transform_6(%arg0: i32, %arg1: i32) -> (i32, i32) {
    %c0_i32 = arith.constant 0 : i32
    %c0_i32_0 = arith.constant 0 : i32
    %c0_i32_1 = arith.constant 0 : i32
    return %c0_i32, %c0_i32_0 : i32, i32
  }
  func.func @transform_7(%arg0: i32, %arg1: i32) -> (i32, i32) {
    %c0_i32 = arith.constant 0 : i32
    %c0_i32_0 = arith.constant 0 : i32
    %c0_i32_1 = arith.constant 0 : i32
    return %c0_i32, %c0_i32_0 : i32, i32
  }
  func.func @transform_8(%arg0: i32, %arg1: i32) -> (i32, i32) {
    %c0_i32 = arith.constant 0 : i32
    %c0_i32_0 = arith.constant 0 : i32
    %c0_i32_1 = arith.constant 0 : i32
    return %c0_i32, %c0_i32_0 : i32, i32
  }
  func.func @transform_9(%arg0: i32, %arg1: i32) -> (i32, i32) {
    %c0_i32 = arith.constant 0 : i32
    %c0_i32_0 = arith.constant 0 : i32
    %c0_i32_1 = arith.constant 0 : i32
    return %c0_i32, %c0_i32_0 : i32, i32
  }
  func.func @transform_10(%arg0: i32, %arg1: i32) -> (i32, i32) {
    %c0_i32 = arith.constant 0 : i32
    %c0_i32_0 = arith.constant 0 : i32
    %c0_i32_1 = arith.constant 0 : i32
    return %c0_i32, %c0_i32_0 : i32, i32
  }
  func.func @transform_11(%arg0: i32, %arg1: i32) -> (i32, i32) {
    %c0_i32 = arith.constant 0 : i32
    %c0_i32_0 = arith.constant 0 : i32
    %c0_i32_1 = arith.constant 0 : i32
    return %c0_i32, %c0_i32_0 : i32, i32
  }
  func.func @transform_12(%arg0: i32, %arg1: i32) -> (i32, i32) {
    %c0_i32 = arith.constant 0 : i32
    %c0_i32_0 = arith.constant 0 : i32
    %c0_i32_1 = arith.constant 0 : i32
    return %c0_i32, %c0_i32_0 : i32, i32
  }
  func.func @transform_13(%arg0: i32, %arg1: i32) -> (i32, i32) {
    %c0_i32 = arith.constant 0 : i32
    %c0_i32_0 = arith.constant 0 : i32
    %c0_i32_1 = arith.constant 0 : i32
    return %c0_i32, %c0_i32_0 : i32, i32
  }
  func.func @transform_14(%arg0: i32, %arg1: i32) -> (i32, i32) {
    %c0_i32 = arith.constant 0 : i32
    %c0_i32_0 = arith.constant 0 : i32
    %c0_i32_1 = arith.constant 0 : i32
    return %c0_i32, %c0_i32_0 : i32, i32
  }
  func.func @transform_15(%arg0: i32, %arg1: i32) -> (i32, i32) {
    %c0_i32 = arith.constant 0 : i32
    %c0_i32_0 = arith.constant 0 : i32
    %c0_i32_1 = arith.constant 0 : i32
    return %c0_i32, %c0_i32_0 : i32, i32
  }
  func.func @transform_16(%arg0: i32, %arg1: i32) -> (i32, i32) {
    %c0_i32 = arith.constant 0 : i32
    %c0_i32_0 = arith.constant 0 : i32
    %c0_i32_1 = arith.constant 0 : i32
    return %c0_i32, %c0_i32_0 : i32, i32
  }
  func.func @transform_17(%arg0: i32, %arg1: i32) -> (i32, i32) {
    %c0_i32 = arith.constant 0 : i32
    %c0_i32_0 = arith.constant 0 : i32
    %c0_i32_1 = arith.constant 0 : i32
    return %c0_i32, %c0_i32_0 : i32, i32
  }
  func.func @transform_18(%arg0: i32, %arg1: i32) -> (i32, i32) {
    %c0_i32 = arith.constant 0 : i32
    %c0_i32_0 = arith.constant 0 : i32
    %c0_i32_1 = arith.constant 0 : i32
    return %c0_i32, %c0_i32_0 : i32, i32
  }
  func.func @transform_19(%arg0: i32, %arg1: i32) -> (i32, i32) {
    %c0_i32 = arith.constant 0 : i32
    %c0_i32_0 = arith.constant 0 : i32
    %c0_i32_1 = arith.constant 0 : i32
    return %c0_i32, %c0_i32_0 : i32, i32
  }
  func.func @transform_20(%arg0: i32, %arg1: i32) -> (i32, i32) {
    %c0_i32 = arith.constant 0 : i32
    %c0_i32_0 = arith.constant 0 : i32
    %c0_i32_1 = arith.constant 0 : i32
    return %c0_i32, %c0_i32_0 : i32, i32
  }
  func.func @transform_21(%arg0: i32, %arg1: i32) -> (i32, i32) {
    %c0_i32 = arith.constant 0 : i32
    %c0_i32_0 = arith.constant 0 : i32
    %c0_i32_1 = arith.constant 0 : i32
    return %c0_i32, %c0_i32_0 : i32, i32
  }
  func.func @transform_22(%arg0: i32, %arg1: i32) -> (i32, i32) {
    %c0_i32 = arith.constant 0 : i32
    %c0_i32_0 = arith.constant 0 : i32
    %c0_i32_1 = arith.constant 0 : i32
    return %c0_i32, %c0_i32_0 : i32, i32
  }
  func.func @transform_23(%arg0: i32, %arg1: i32) -> (i32, i32, i32) {
    %c0_i32 = arith.constant 0 : i32
    %c0_i32_0 = arith.constant 0 : i32
    return %arg0, %arg1, %c0_i32 : i32, i32, i32
  }
}

</mosaic_0001>

<bundles_post_ra>
// kernel: tpu_custom_call.1
= control target key start
LH: loop header
LB: loop body
LE: loop exit
PB: predicated region body
PF: predicated region fallthrough
CT: control target
= control target key end

     0   :  { %s6508_s0 = inlined_call_operand.hbm [shape: f32[2,16,128], index: 0, kind: input, shape index: {}]   ;;  %s6509_s1 = inlined_call_operand.hbm [shape: bf16[128,128], index: 1, kind: input, shape index: {}]   ;;  %s6510_s2 = inlined_call_operand.hbm [shape: f32[1,128], index: 2, kind: input, shape index: {}]   ;;  %s6511_s3 = inlined_call_operand.hbm [shape: bf16[128,256], index: 3, kind: input, shape index: {}]   ;;  %s6512_s4 = inlined_call_operand.hbm [shape: f32[1,256], index: 4, kind: input, shape index: {}]   ;;  %s6513_s5 = inlined_call_operand.hbm [shape: bf16[128,128], index: 5, kind: input, shape index: {}]   ;;  %s6514_s6 = inlined_call_operand.hbm [shape: f32[1,128], index: 6, kind: input, shape index: {}]   ;;  %s6515_s7 = inlined_call_operand.hbm [shape: bf16[128,128], index: 7, kind: input, shape index: {}]   ;;  %s6516_s8 = inlined_call_operand.hbm [shape: f32[1,128], index: 8, kind: input, shape index: {}]   ;;  %s6517_s9 = inlined_call_operand.hbm [shape: bf16[128,128], index: 9, kind: input, shape index: {}]   ;;  %s6518_s10 = inlined_call_operand.hbm [shape: f32[1,128], index: 10, kind: input, shape index: {}]   ;;  %s6519_s11 = inlined_call_operand.hbm [shape: f32[1,128], index: 11, kind: input, shape index: {}]   ;;  %s6520_s12 = inlined_call_operand.hbm [shape: f32[1,128], index: 12, kind: input, shape index: {}]   ;;  %s6521_s13 = inlined_call_operand.hbm [shape: bf16[128,256], index: 13, kind: input, shape index: {}]   ;;  %s6522_s14 = inlined_call_operand.hbm [shape: f32[1,256], index: 14, kind: input, shape index: {}]   ;;  %s6523_s15 = inlined_call_operand.hbm [shape: bf16[256,128], index: 15, kind: input, shape index: {}]   ;;  %s6524_s16 = inlined_call_operand.hbm [shape: f32[1,128], index: 16, kind: input, shape index: {}]   ;;  %s6525_s17 = inlined_call_operand.vmem [shape: bf16[128,128], index: 17, kind: input, shape index: {}]   ;;  %s6526_s18 = inlined_call_operand.vmem [shape: f32[1,128], index: 18, kind: input, shape index: {}]   ;;  %s6527_s19 = inlined_call_operand.hbm [shape: bf16[128,128], index: 19, kind: input, shape index: {}]   ;;  %s6528_s20 = inlined_call_operand.vmem [shape: f32[1,128], index: 20, kind: input, shape index: {}]   ;;  %s6529_s21 = inlined_call_operand.vmem [shape: f32[1,128], index: 21, kind: input, shape index: {}]   ;;  %s6530_s22 = inlined_call_operand.vmem [shape: f32[1,128], index: 22, kind: input, shape index: {}]   ;;  %s6531_s23 = inlined_call_operand.hbm [shape: f32[2,16,128], index: 23, kind: output, shape index: {}]  }
   0x1   :  { %6571 = sst [smem:[#allocation55_spill]] %s6508_s0 }
   0x2   :  { %6572 = sst [smem:[#allocation56_spill]] %s6509_s1 }
   0x3   :  { %6573 = sst [smem:[#allocation57_spill]] %s6510_s2 }
   0x4   :  { %6574 = sst [smem:[#allocation58_spill]] %s6511_s3 }
   0x5   :  { %6575 = sst [smem:[#allocation59_spill]] %s6512_s4 }
   0x6   :  { %6576 = sst [smem:[#allocation60_spill]] %s6513_s5 }
   0x7   :  { %6577 = sst [smem:[#allocation61_spill]] %s6514_s6 }
   0x8   :  { %6578 = sst [smem:[#allocation62_spill]] %s6515_s7 }
   0x9   :  { %6579 = sst [smem:[#allocation63_spill]] %s6516_s8 }
   0xa   :  { %6580 = sst [smem:[#allocation64_spill]] %s6517_s9 }
   0xb   :  { %6581 = sst [smem:[#allocation65_spill]] %s6518_s10 }
   0xc   :  { %6582 = sst [smem:[#allocation66_spill]] %s6519_s11 }
   0xd   :  { %6583 = sst [smem:[#allocation67_spill]] %s6520_s12 }
   0xe   :  { %6584 = sst [smem:[#allocation68_spill]] %s6521_s13 }
   0xf   :  { %6585 = sst [smem:[#allocation69_spill]] %s6522_s14 }
  0x10   :  { %6586 = sst [smem:[#allocation70_spill]] %s6523_s15 }
  0x11   :  { %6587 = sst [smem:[#allocation71_spill]] %s6524_s16 }
  0x12   :  { %6588 = sst [smem:[#allocation72_spill]] %s6525_s17 }
  0x13   :  { %6589 = sst [smem:[#allocation73_spill]] %s6526_s18 }
  0x14   :  { %6590 = sst [smem:[#allocation74_spill]] %s6528_s20 }
  0x15   :  { %6591 = sst [smem:[#allocation75_spill]] %s6529_s21 }
  0x16   :  { %6592 = sst [smem:[#allocation76_spill]] %s6530_s22 }
  0x17   :  { %6593 = sst [smem:[#allocation77_spill]] %s6531_s23 }
  0x18   :  { %28 = vsyncpa [#allocation5], 0 }
  0x19   :  { %30 = vsyncpa [#allocation5 + $0x1], 0 }
  0x1a   :  { %31 = vsyncpa [#allocation8], 0 }
  0x1b   :  { %32 = vsyncpa [#allocation11], 0 }
  0x1c   :  { %33 = vsyncpa [#allocation14], 0 }
  0x1d   :  { %34 = vsyncpa [#allocation17], 0 }
  0x1e   :  { %35 = vsyncpa [#allocation20], 0 }
  0x1f   :  { %36 = vsyncpa [#allocation23], 0 }
  0x20   :  { %37 = vsyncpa [#allocation26], 0 }
  0x21   :  { %38 = vsyncpa [#allocation29], 0 }
  0x22   :  { %39 = vsyncpa [#allocation32], 0 }
  0x23   :  { %40 = vsyncpa [#allocation6], 0 }
  0x24   :  { %42 = vsyncpa [#allocation6 + $0x1], 0  ;;  %s5487_s4 = smov 0   ;;  %s5489_s30 = smov 0  }
  0x25   :  { %s5491_s24 = smov 0   ;;  %s5493_s25 = smov 0  }
  0x26   :  { %s5495_s5 = smov 0   ;;  %s5497_s1 = smov 0  }
  0x27   :  { %s5499_s26 = smov 0   ;;  %s5501_s2 = smov 0  }
  0x28   :  { %s5503_s6 = smov 0   ;;  %s5505_s27 = smov 0  }
  0x29   :  { %s5507_s7 = smov 0  }
  0x2a LB: > { %6594 = sst [smem:[#allocation45_spill]] %s5288_s4  ;;  %s6541_s28 = sadd.s32 4294967295, %s5328_s7   ;;  %s5328_s7 = sphi %s5507_s7, %s48_s7   ;;  %s5324_s27 = sphi %s5505_s27, %s6681_s27   ;;  %s5320_s6 = sphi %s5503_s6, %s6680_s6   ;;  %s5316_s2 = sphi %s5501_s2, %s6679_s2   ;;  %s5312_s26 = sphi %s5499_s26, %s6678_s26   ;;  %s5308_s1 = sphi %s5497_s1, %s6677_s1   ;;  %s5304_s5 = sphi %s5495_s5, %s6671_s5   ;;  %s5300_s25 = sphi %s5493_s25, %s6676_s25   ;;  %s5296_s24 = sphi %s5491_s24, %s6675_s24   ;;  %s5292_s30 = sphi %s5489_s30, %s6668_s30   ;;  %s5288_s4 = sphi %s5487_s4, %s6674_s4  }
  0x2b   : > { %6595 = sst [smem:[#allocation46_spill]] %s5292_s30  ;;  %p3796_p0 = scmp.ge.s32.totalorder %s5328_s7, 1 }
  0x2c   : > { %6596 = sst [smem:[#allocation47_spill]] %s5296_s24  ;;  %p5546_p1 = scmp.eq.s32.totalorder %s6541_s28, 0 }
  0x2d   : > { %6597 = sst [smem:[#allocation48_spill]] %s5300_s25  ;;  %p581_p2 = scmp.lt.s32.totalorder %s5328_s7, 5 }
  0x2e   : > { %6598 = sst [smem:[#allocation49_spill]] %s5304_s5  ;;  %s5330_s0 = smov [#allocation7]  }
  0x2f   : > { %6599 = sst [smem:[#allocation50_spill]] %s5308_s1  ;;  %p5551_p3 = pnand %p3796_p0, %p581_p2 }
  0x30   : > { %6600 = sst [smem:[#allocation51_spill]] %s5312_s26  ;;  %s593_s23 = sshll.u32 %s5330_s0, 4  ;;  %s594_s23 = int_to_ptr.vmem [resolvable:$true] %s593_s23 }
  0x31   : > { %6601 = sst [smem:[#allocation52_spill]] %s5316_s2  ;;  %p4305_p4 = pneg %p5551_p3 }
  0x32   : > { %s6602_s29 = scalar_select %p5546_p1, 1, 0 }
  0x33   : > { %s6604_s3 = scalar_select %p5551_p3, 1, 0 }
  0x34   : > { %6603 = sst [smem:[#allocation53_spill]] %s6602_s29  ;;  %p5559_p5 = pnand %p4305_p4, %p5546_p1 }
  0x35   : > { %6605 = sst [smem:[#allocation54_spill]] %s6604_s3  ;;  %s5331_s28 = smov [#allocation10]  }
  0x36   : > { %s617_s21 = sshll.u32 %s5331_s28, 4  ;;  %s6607_s18 = sld [smem:[#allocation56_spill]]  ;;  %s5563_s21 = int_to_ptr.vmem [resolvable:$true] %s617_s21 }
  0x37   : > { %p5573_p7 = pneg %p5559_p5 }
  0x3c   : > { %s4664_s17 = scalar_lea.hbm %s6607_s18, 1024 }
  0x3d   : > { %p4665_p6 = scmp.ne.s32.totalorder %s6607_s18, %s4664_s17  ;;  %p4671_p10 = scmp.lt.u32.totalorder %s4664_s17, %s6607_s18 }
  0x3f   : > { %p4667_p8 = pnand %p5573_p7, %p4665_p6 }
  0x41   : > { %p4668_p9 = pneg %p4667_p8 }
  0x43   : > { %p4673_p11 = pnand %p4671_p10, %p4668_p9 }
  0x45   : > { %4676 = shalt.err (!%p4673_p11)
}
  0x46   : > { %s4677_s20 = scalar_lea.vmem %s594_s23, 1024  ;;  %p4685_p2 = scmp.lt.s32.totalorder %s594_s23, %s594_s23 }
  0x47   : > { %p4678_p12 = scmp.ne.s32.totalorder %s594_s23, %s4677_s20  ;;  %p4686_p4 = scmp.lt.s32.totalorder %s4677_s20, %s4677_s20 }
  0x49   : > { %p4680_p13 = pnand %p4678_p12, %p5573_p7  ;;  %p4687_p3 = por %p4686_p4, %p4685_p2 }
  0x4b   : > { %p4681_p0 = pneg %p4680_p13 }
  0x4d   : > { %p4688_p1 = pnand %p4687_p3, %p4681_p0 }
  0x4f   : > { %4691 = shalt.err (!%p4688_p1)
}
  0x50   : > { %s6555_s4 = smov 64   ;;  %s6557_s26 = smov 4  }
  0x51   : > { %4308 = dma.hbm_to_vmem [thread:$0]  (!%p5559_p5), %s6607_s18, 1024, %s594_s23, [#allocation8], %s6555_s4, %s6555_s4, %s6557_s26  }
  0x52   : > { %s6609_s30 = sld [smem:[#allocation58_spill]] }
  0x58   : > { %s6610_s29 = smov %s6609_s30  ;;  %s4692_s24 = scalar_lea.hbm %s6609_s30, 2048 }
  0x59   : > { %p4693_p1 = scmp.ne.s32.totalorder %s6610_s29, %s4692_s24  ;;  %p4699_p8 = scmp.lt.u32.totalorder %s4692_s24, %s6610_s29 }
  0x5b   : > { %p4695_p3 = pnand %p4693_p1, %p5573_p7 }
  0x5d   : > { %p4696_p6 = pneg %p4695_p3 }
  0x5f   : > { %p4701_p9 = pnand %p4699_p8, %p4696_p6 }
  0x61   : > { %4704 = shalt.err (!%p4701_p9)
}
  0x62   : > { %s4705_s23 = scalar_lea.vmem %s5563_s21, 2048  ;;  %p4713_p13 = scmp.lt.s32.totalorder %s5563_s21, %s5563_s21 }
  0x63   : > { %p4706_p10 = scmp.ne.s32.totalorder %s5563_s21, %s4705_s23  ;;  %p4714_p0 = scmp.lt.s32.totalorder %s4705_s23, %s4705_s23 }
  0x65   : > { %p4708_p11 = pnand %p4706_p10, %p5573_p7  ;;  %p4715_p2 = por %p4714_p0, %p4713_p13 }
  0x67   : > { %p4709_p12 = pneg %p4708_p11 }
  0x69   : > { %p4716_p4 = pnand %p4715_p2, %p4709_p12 }
  0x6b   : > { %4719 = shalt.err (!%p4716_p4)
}
  0x6c   : > { %s6560_s30 = smov 128   ;;  %s6562_s24 = smov 8  }
  0x6d   : > { %4314 = dma.hbm_to_vmem [thread:$0]  (!%p5559_p5), %s6610_s29, 2048, %s5563_s21, [#allocation11], %s6560_s30, %s6560_s30, %s6562_s24  }
  0x6e   : > { %s5336_s1 = smov [#allocation13]   ;;  %s5337_s2 = smov [#allocation16]  }
  0x6f   : > { %s641_s17 = sshll.u32 %s5336_s1, 4  ;;  %s665_s3 = sshll.u32 %s5337_s2, 4  ;;  %s642_s17 = int_to_ptr.vmem [resolvable:$true] %s641_s17  ;;  %s5618_s3 = int_to_ptr.vmem [resolvable:$true] %s665_s3 }
  0x70   : > { %s6611_s23 = sld [smem:[#allocation60_spill]] }
  0x76   : > { %s4720_s4 = scalar_lea.hbm %s6611_s23, 1024 }
  0x77   : > { %p4721_p1 = scmp.ne.s32.totalorder %s6611_s23, %s4720_s4  ;;  %p4727_p8 = scmp.lt.u32.totalorder %s4720_s4, %s6611_s23 }
  0x79   : > { %p4723_p3 = pnand %p4721_p1, %p5573_p7 }
  0x7b   : > { %p4724_p6 = pneg %p4723_p3 }
  0x7d   : > { %p4729_p9 = pnand %p4727_p8, %p4724_p6 }
  0x7f   : > { %4732 = shalt.err (!%p4729_p9)
}
  0x80   : > { %s4733_s5 = scalar_lea.vmem %s642_s17, 1024  ;;  %p4741_p13 = scmp.lt.s32.totalorder %s642_s17, %s642_s17 }
  0x81   : > { %p4734_p10 = scmp.ne.s32.totalorder %s642_s17, %s4733_s5  ;;  %p4742_p0 = scmp.lt.s32.totalorder %s4733_s5, %s4733_s5 }
  0x83   : > { %p4736_p11 = pnand %p4734_p10, %p5573_p7  ;;  %p4743_p2 = por %p4742_p0, %p4741_p13 }
  0x85   : > { %p4737_p12 = pneg %p4736_p11 }
  0x87   : > { %p4744_p4 = pnand %p4743_p2, %p4737_p12 }
  0x89   : > { %4747 = shalt.err (!%p4744_p4)
}
  0x8a   : > { %s6612_s18 = smov 4   ;;  %s6613_s26 = smov 64  }
  0x8b   : > { %4320 = dma.hbm_to_vmem [thread:$0]  (!%p5559_p5), %s6611_s23, 1024, %s642_s17, [#allocation14], %s6613_s26, %s6613_s26, %s6612_s18  }
  0x8c   : > { %s6614_s20 = sld [smem:[#allocation62_spill]] }
  0x92   : > { %s4748_s25 = scalar_lea.hbm %s6614_s20, 1024 }
  0x93   : > { %p4749_p1 = scmp.ne.s32.totalorder %s6614_s20, %s4748_s25  ;;  %p4755_p8 = scmp.lt.u32.totalorder %s4748_s25, %s6614_s20 }
  0x95   : > { %p4751_p3 = pnand %p4749_p1, %p5573_p7 }
  0x97   : > { %p4752_p6 = pneg %p4751_p3 }
  0x99   : > { %p4757_p9 = pnand %p4755_p8, %p4752_p6 }
  0x9b   : > { %4760 = shalt.err (!%p4757_p9)
}
  0x9c   : > { %s4761_s17 = scalar_lea.vmem %s5618_s3, 1024  ;;  %p4769_p13 = scmp.lt.s32.totalorder %s5618_s3, %s5618_s3 }
  0x9d   : > { %p4762_p10 = scmp.ne.s32.totalorder %s5618_s3, %s4761_s17  ;;  %p4770_p0 = scmp.lt.s32.totalorder %s4761_s17, %s4761_s17 }
  0x9f   : > { %p4764_p11 = pnand %p4762_p10, %p5573_p7  ;;  %p4771_p2 = por %p4770_p0, %p4769_p13 }
  0xa1   : > { %p4765_p12 = pneg %p4764_p11 }
  0xa3   : > { %p4772_p4 = pnand %p4771_p2, %p4765_p12 }
  0xa5   : > { %4775 = shalt.err (!%p4772_p4)
}
  0xa6   : > { %4326 = dma.hbm_to_vmem [thread:$0]  (!%p5559_p5), %s6614_s20, 1024, %s5618_s3, [#allocation17], %s6613_s26, %s6613_s26, %s6612_s18  }
  0xa7   : > { %s5338_s1 = smov [#allocation19]   ;;  %s5339_s2 = smov [#allocation22]  }
  0xa8   : > { %s689_s4 = sshll.u32 %s5338_s1, 4  ;;  %s714_s28 = sshll.u32 %s5339_s2, 4  ;;  %s690_s4 = int_to_ptr.vmem [resolvable:$true] %s689_s4  ;;  %s5667_s28 = int_to_ptr.vmem [resolvable:$true] %s714_s28 }
  0xa9   : > { %s6615_s9 = sld [smem:[#allocation64_spill]] }
  0xaf   : > { %s4776_s5 = scalar_lea.hbm %s6615_s9, 1024 }
  0xb0   : > { %p4777_p1 = scmp.ne.s32.totalorder %s6615_s9, %s4776_s5  ;;  %p4783_p8 = scmp.lt.u32.totalorder %s4776_s5, %s6615_s9 }
  0xb2   : > { %p4779_p3 = pnand %p4777_p1, %p5573_p7 }
  0xb4   : > { %p4780_p6 = pneg %p4779_p3 }
  0xb6   : > { %p4785_p9 = pnand %p4783_p8, %p4780_p6 }
  0xb8   : > { %4788 = shalt.err (!%p4785_p9)
}
  0xb9   : > { %s4789_s24 = scalar_lea.vmem %s690_s4, 1024  ;;  %p4797_p13 = scmp.lt.s32.totalorder %s690_s4, %s690_s4 }
  0xba   : > { %p4790_p10 = scmp.ne.s32.totalorder %s690_s4, %s4789_s24  ;;  %p4798_p0 = scmp.lt.s32.totalorder %s4789_s24, %s4789_s24 }
  0xbc   : > { %p4792_p11 = pnand %p4790_p10, %p5573_p7  ;;  %p4799_p2 = por %p4798_p0, %p4797_p13 }
  0xbe   : > { %p4793_p12 = pneg %p4792_p11 }
  0xc0   : > { %p4800_p4 = pnand %p4799_p2, %p4793_p12 }
  0xc2   : > { %4803 = shalt.err (!%p4800_p4)
}
  0xc3   : > { %4332 = dma.hbm_to_vmem [thread:$0]  (!%p5559_p5), %s6615_s9, 1024, %s690_s4, [#allocation20], %s6613_s26, %s6613_s26, %s6612_s18  }
  0xc4   : > { %s6616_s11 = sld [smem:[#allocation66_spill]] }
  0xca   : > { %s4804_s21 = scalar_lea.hbm %s6616_s11, 16 }
  0xcb   : > { %p4805_p1 = scmp.ne.s32.totalorder %s6616_s11, %s4804_s21  ;;  %p4811_p8 = scmp.lt.u32.totalorder %s4804_s21, %s6616_s11 }
  0xcd   : > { %p4807_p3 = pnand %p4805_p1, %p5573_p7 }
  0xcf   : > { %p4808_p6 = pneg %p4807_p3 }
  0xd1   : > { %p4813_p9 = pnand %p4811_p8, %p4808_p6 }
  0xd3   : > { %4816 = shalt.err (!%p4813_p9)
}
  0xd4   : > { %s4817_s4 = scalar_lea.vmem %s5667_s28, 16  ;;  %s4824_s24 = scalar_lea.vmem %s5667_s28, 32 }
  0xd5   : > { %p4818_p10 = scmp.ne.s32.totalorder %s5667_s28, %s4817_s4  ;;  %p4825_p13 = scmp.lt.s32.totalorder %s5667_s28, %s5667_s28 }
  0xd6   : > { %p4826_p0 = scmp.lt.s32.totalorder %s4824_s24, %s4817_s4 }
  0xd7   : > { %p4820_p11 = pnand %p4818_p10, %p5573_p7 }
  0xd8   : > { %p4827_p2 = por %p4826_p0, %p4825_p13 }
  0xd9   : > { %p4821_p12 = pneg %p4820_p11 }
  0xdb   : > { %p4828_p4 = pnand %p4827_p2, %p4821_p12 }
  0xdd   : > { %4831 = shalt.err (!%p4828_p4)
}
  0xde   : > { %4338 = dma.hbm_to_vmem [thread:$0]  (!%p5559_p5), %s6616_s11, 16, %s5667_s28, [#allocation23]  }
  0xdf   : > { %s5340_s2 = smov [#allocation25]   ;;  %s5341_s21 = smov [#allocation28]  }
  0xe0   : > { %s735_s25 = sshll.u32 %s5340_s2, 4  ;;  %s759_s5 = sshll.u32 %s5341_s21, 4  ;;  %s736_s25 = int_to_ptr.vmem [resolvable:$true] %s735_s25  ;;  %s5714_s5 = int_to_ptr.vmem [resolvable:$true] %s759_s5 }
  0xe1   : > { %s6617_s13 = sld [smem:[#allocation68_spill]] }
  0xe7   : > { %s4832_s3 = scalar_lea.hbm %s6617_s13, 2048 }
  0xe8   : > { %p4833_p1 = scmp.ne.s32.totalorder %s6617_s13, %s4832_s3  ;;  %p4839_p8 = scmp.lt.u32.totalorder %s4832_s3, %s6617_s13 }
  0xea   : > { %p4835_p3 = pnand %p4833_p1, %p5573_p7 }
  0xec   : > { %p4836_p6 = pneg %p4835_p3 }
  0xee   : > { %p4841_p9 = pnand %p4839_p8, %p4836_p6 }
  0xf0   : > { %4844 = shalt.err (!%p4841_p9)
}
  0xf1   : > { %s4845_s1 = scalar_lea.vmem %s736_s25, 2048  ;;  %p4853_p13 = scmp.lt.s32.totalorder %s736_s25, %s736_s25 }
  0xf2   : > { %p4846_p10 = scmp.ne.s32.totalorder %s736_s25, %s4845_s1  ;;  %p4854_p0 = scmp.lt.s32.totalorder %s4845_s1, %s4845_s1 }
  0xf4   : > { %p4848_p11 = pnand %p4846_p10, %p5573_p7  ;;  %p4855_p2 = por %p4854_p0, %p4853_p13 }
  0xf6   : > { %p4849_p12 = pneg %p4848_p11 }
  0xf8   : > { %p4856_p4 = pnand %p4855_p2, %p4849_p12 }
  0xfa   : > { %4859 = shalt.err (!%p4856_p4)
}
  0xfb   : > { %s6618_s2 = smov 8   ;;  %s6619_s21 = smov 128  }
  0xfc   : > { %4344 = dma.hbm_to_vmem [thread:$0]  (!%p5559_p5), %s6617_s13, 2048, %s736_s25, [#allocation26], %s6619_s21, %s6619_s21, %s6618_s2  }
  0xfd   : > { %s6620_s15 = sld [smem:[#allocation70_spill]] }
 0x103   : > { %s4860_s24 = scalar_lea.hbm %s6620_s15, 2048 }
 0x104   : > { %p4861_p1 = scmp.ne.s32.totalorder %s6620_s15, %s4860_s24  ;;  %p4867_p8 = scmp.lt.u32.totalorder %s4860_s24, %s6620_s15 }
 0x106   : > { %p4863_p3 = pnand %p4861_p1, %p5573_p7 }
 0x108   : > { %p4864_p6 = pneg %p4863_p3 }
 0x10a   : > { %p4869_p9 = pnand %p4867_p8, %p4864_p6 }
 0x10c   : > { %4872 = shalt.err (!%p4869_p9)
}
 0x10d   : > { %s4873_s25 = scalar_lea.vmem %s5714_s5, 2048  ;;  %p4881_p13 = scmp.lt.s32.totalorder %s5714_s5, %s5714_s5 }
 0x10e   : > { %p4874_p10 = scmp.ne.s32.totalorder %s5714_s5, %s4873_s25  ;;  %p4882_p0 = scmp.lt.s32.totalorder %s4873_s25, %s4873_s25 }
 0x110   : > { %p4876_p11 = pnand %p4874_p10, %p5573_p7  ;;  %p4883_p2 = por %p4882_p0, %p4881_p13 }
 0x112   : > { %p4877_p12 = pneg %p4876_p11 }
 0x114   : > { %p4884_p4 = pnand %p4883_p2, %p4877_p12 }
 0x116   : > { %4887 = shalt.err (!%p4884_p4)
}
 0x117   : > { %4350 = dma.hbm_to_vmem [thread:$0]  (!%p5559_p5), %s6620_s15, 2048, %s5714_s5, [#allocation29], %s6613_s26, %s6613_s26, %s6612_s18  }
 0x118   : > { %s5342_s30 = smov [#allocation9]   ;;  %s5343_s4 = smov [#allocation12]  }
 0x119   : > { %s607_s3 = sshll.u32 %s5342_s30, 4  ;;  %s631_s24 = sshll.u32 %s5343_s4, 4  ;;  %s608_s3 = int_to_ptr.vmem [resolvable:$true] %s607_s3  ;;  %s5763_s24 = int_to_ptr.vmem [resolvable:$true] %s631_s24 }
 0x11a   : > { %s6621_s1 = sld [smem:[#allocation57_spill]] }
 0x120   : > { %s6622_s11 = smov %s6621_s1  ;;  %s4888_s25 = scalar_lea.hbm %s6621_s1, 16 }
 0x121   : > { %p4889_p1 = scmp.ne.s32.totalorder %s6622_s11, %s4888_s25  ;;  %p4895_p8 = scmp.lt.u32.totalorder %s4888_s25, %s6622_s11 }
 0x123   : > { %p4891_p3 = pnand %p4889_p1, %p5573_p7 }
 0x125   : > { %p4892_p6 = pneg %p4891_p3 }
 0x127   : > { %p4897_p9 = pnand %p4895_p8, %p4892_p6 }
 0x129   : > { %4900 = shalt.err (!%p4897_p9)
}
 0x12a   : > { %s4901_s17 = scalar_lea.vmem %s608_s3, 16  ;;  %s4908_s30 = scalar_lea.vmem %s608_s3, 32 }
 0x12b   : > { %p4902_p10 = scmp.ne.s32.totalorder %s608_s3, %s4901_s17  ;;  %p4909_p13 = scmp.lt.s32.totalorder %s608_s3, %s608_s3 }
 0x12c   : > { %p4910_p0 = scmp.lt.s32.totalorder %s4908_s30, %s4901_s17 }
 0x12d   : > { %p4904_p11 = pnand %p4902_p10, %p5573_p7 }
 0x12e   : > { %p4911_p2 = por %p4910_p0, %p4909_p13 }
 0x12f   : > { %p4905_p12 = pneg %p4904_p11 }
 0x131   : > { %p4912_p4 = pnand %p4911_p2, %p4905_p12 }
 0x133   : > { %4915 = shalt.err (!%p4912_p4)
}
 0x134   : > { %4311 = dma.hbm_to_vmem [thread:$0]  (!%p5559_p5), %s6622_s11, 16, %s608_s3, [#allocation8]  }
 0x135   : > { %s6623_s28 = sld [smem:[#allocation59_spill]] }
 0x13b   : > { %s4916_s1 = scalar_lea.hbm %s6623_s28, 32 }
 0x13c   : > { %p4917_p1 = scmp.ne.s32.totalorder %s6623_s28, %s4916_s1  ;;  %p4923_p8 = scmp.lt.u32.totalorder %s4916_s1, %s6623_s28 }
 0x13e   : > { %p4919_p3 = pnand %p4917_p1, %p5573_p7 }
 0x140   : > { %p4920_p6 = pneg %p4919_p3 }
 0x142   : > { %p4925_p9 = pnand %p4923_p8, %p4920_p6 }
 0x144   : > { %4928 = shalt.err (!%p4925_p9)
}
 0x145   : > { %s4929_s3 = scalar_lea.vmem %s5763_s24, 32  ;;  %p4937_p13 = scmp.lt.s32.totalorder %s5763_s24, %s5763_s24 }
 0x146   : > { %p4930_p10 = scmp.ne.s32.totalorder %s5763_s24, %s4929_s3  ;;  %p4938_p0 = scmp.lt.s32.totalorder %s4929_s3, %s4929_s3 }
 0x148   : > { %p4932_p11 = pnand %p4930_p10, %p5573_p7  ;;  %p4939_p2 = por %p4938_p0, %p4937_p13 }
 0x14a   : > { %p4933_p12 = pneg %p4932_p11 }
 0x14c   : > { %p4940_p4 = pnand %p4939_p2, %p4933_p12 }
 0x14e   : > { %4943 = shalt.err (!%p4940_p4)
}
 0x14f   : > { %4317 = dma.hbm_to_vmem [thread:$0]  (!%p5559_p5), %s6623_s28, 32, %s5763_s24, [#allocation11]  }
 0x150   : > { %s5344_s20 = smov [#allocation15]   ;;  %s5345_s23 = smov [#allocation18]  }
 0x151   : > { %s655_s4 = sshll.u32 %s5344_s20, 4  ;;  %s679_s1 = sshll.u32 %s5345_s23, 4  ;;  %s656_s4 = int_to_ptr.vmem [resolvable:$true] %s655_s4  ;;  %s5806_s1 = int_to_ptr.vmem [resolvable:$true] %s679_s1 }
 0x152   : > { %s6624_s5 = sld [smem:[#allocation61_spill]] }
 0x158   : > { %s6625_s17 = smov %s6624_s5  ;;  %s4944_s3 = scalar_lea.hbm %s6624_s5, 16 }
 0x159   : > { %p4945_p1 = scmp.ne.s32.totalorder %s6625_s17, %s4944_s3  ;;  %p4951_p8 = scmp.lt.u32.totalorder %s4944_s3, %s6625_s17 }
 0x15b   : > { %p4947_p3 = pnand %p4945_p1, %p5573_p7 }
 0x15d   : > { %p4948_p6 = pneg %p4947_p3 }
 0x15f   : > { %p4953_p9 = pnand %p4951_p8, %p4948_p6 }
 0x161   : > { %4956 = shalt.err (!%p4953_p9)
}
 0x162   : > { %s4957_s13 = scalar_lea.vmem %s656_s4, 16  ;;  %s4964_s20 = scalar_lea.vmem %s656_s4, 32 }
 0x163   : > { %p4958_p10 = scmp.ne.s32.totalorder %s656_s4, %s4957_s13  ;;  %p4965_p13 = scmp.lt.s32.totalorder %s656_s4, %s656_s4 }
 0x164   : > { %p4966_p0 = scmp.lt.s32.totalorder %s4964_s20, %s4957_s13 }
 0x165   : > { %p4960_p11 = pnand %p4958_p10, %p5573_p7 }
 0x166   : > { %p4967_p2 = por %p4966_p0, %p4965_p13 }
 0x167   : > { %p4961_p12 = pneg %p4960_p11 }
 0x169   : > { %p4968_p4 = pnand %p4967_p2, %p4961_p12 }
 0x16b   : > { %4971 = shalt.err (!%p4968_p4)
}
 0x16c   : > { %4323 = dma.hbm_to_vmem [thread:$0]  (!%p5559_p5), %s6625_s17, 16, %s656_s4, [#allocation14]  }
 0x16d   : > { %s6626_s8 = sld [smem:[#allocation63_spill]] }
 0x173   : > { %s4972_s9 = scalar_lea.hbm %s6626_s8, 16 }
 0x174   : > { %p4973_p1 = scmp.ne.s32.totalorder %s6626_s8, %s4972_s9  ;;  %p4979_p8 = scmp.lt.u32.totalorder %s4972_s9, %s6626_s8 }
 0x176   : > { %p4975_p3 = pnand %p4973_p1, %p5573_p7 }
 0x178   : > { %p4976_p6 = pneg %p4975_p3 }
 0x17a   : > { %p4981_p9 = pnand %p4979_p8, %p4976_p6 }
 0x17c   : > { %4984 = shalt.err (!%p4981_p9)
}
 0x17d   : > { %s4985_s4 = scalar_lea.vmem %s5806_s1, 16  ;;  %s4992_s13 = scalar_lea.vmem %s5806_s1, 32 }
 0x17e   : > { %p4986_p10 = scmp.ne.s32.totalorder %s5806_s1, %s4985_s4  ;;  %p4993_p13 = scmp.lt.s32.totalorder %s5806_s1, %s5806_s1 }
 0x17f   : > { %p4994_p0 = scmp.lt.s32.totalorder %s4992_s13, %s4985_s4 }
 0x180   : > { %p4988_p11 = pnand %p4986_p10, %p5573_p7 }
 0x181   : > { %p4995_p2 = por %p4994_p0, %p4993_p13 }
 0x182   : > { %p4989_p12 = pneg %p4988_p11 }
 0x184   : > { %p4996_p4 = pnand %p4995_p2, %p4989_p12 }
 0x186   : > { %4999 = shalt.err (!%p4996_p4)
}
 0x187   : > { %4329 = dma.hbm_to_vmem [thread:$0]  (!%p5559_p5), %s6626_s8, 16, %s5806_s1, [#allocation17]  }
 0x188   : > { %s5346_s15 = smov [#allocation21]   ;;  %s5347_s25 = smov [#allocation24]  }
 0x189   : > { %s703_s23 = sshll.u32 %s5346_s15, 4  ;;  %s725_s9 = sshll.u32 %s5347_s25, 4  ;;  %s704_s23 = int_to_ptr.vmem [resolvable:$true] %s703_s23  ;;  %s5850_s9 = int_to_ptr.vmem [resolvable:$true] %s725_s9 }
 0x18a   : > { %s6627_s10 = sld [smem:[#allocation65_spill]] }
 0x190   : > { %s5000_s30 = scalar_lea.hbm %s6627_s10, 16 }
 0x191   : > { %p5001_p1 = scmp.ne.s32.totalorder %s6627_s10, %s5000_s30  ;;  %p5007_p8 = scmp.lt.u32.totalorder %s5000_s30, %s6627_s10 }
 0x193   : > { %p5003_p3 = pnand %p5001_p1, %p5573_p7 }
 0x195   : > { %p5004_p6 = pneg %p5003_p3 }
 0x197   : > { %p5009_p9 = pnand %p5007_p8, %p5004_p6 }
 0x199   : > { %5012 = shalt.err (!%p5009_p9)
}
 0x19a   : > { %s5013_s20 = scalar_lea.vmem %s704_s23, 16  ;;  %s5020_s11 = scalar_lea.vmem %s704_s23, 32 }
 0x19b   : > { %p5014_p10 = scmp.ne.s32.totalorder %s704_s23, %s5013_s20  ;;  %p5021_p13 = scmp.lt.s32.totalorder %s704_s23, %s704_s23 }
 0x19c   : > { %p5022_p0 = scmp.lt.s32.totalorder %s5020_s11, %s5013_s20 }
 0x19d   : > { %p5016_p11 = pnand %p5014_p10, %p5573_p7 }
 0x19e   : > { %p5023_p2 = por %p5022_p0, %p5021_p13 }
 0x19f   : > { %p5017_p12 = pneg %p5016_p11 }
 0x1a1   : > { %p5024_p4 = pnand %p5023_p2, %p5017_p12 }
 0x1a3   : > { %5027 = shalt.err (!%p5024_p4)
}
 0x1a4   : > { %4335 = dma.hbm_to_vmem [thread:$0]  (!%p5559_p5), %s6627_s10, 16, %s704_s23, [#allocation20]  }
 0x1a5   : > { %s6628_s12 = sld [smem:[#allocation67_spill]] }
 0x1ab   : > { %s5028_s30 = scalar_lea.hbm %s6628_s12, 16 }
 0x1ac   : > { %p5029_p1 = scmp.ne.s32.totalorder %s6628_s12, %s5028_s30  ;;  %p5035_p8 = scmp.lt.u32.totalorder %s5028_s30, %s6628_s12 }
 0x1ae   : > { %p5031_p3 = pnand %p5029_p1, %p5573_p7 }
 0x1b0   : > { %p5032_p6 = pneg %p5031_p3 }
 0x1b2   : > { %p5037_p9 = pnand %p5035_p8, %p5032_p6 }
 0x1b4   : > { %5040 = shalt.err (!%p5037_p9)
}
 0x1b5   : > { %s5041_s23 = scalar_lea.vmem %s5850_s9, 16  ;;  %s5048_s20 = scalar_lea.vmem %s5850_s9, 32 }
 0x1b6   : > { %p5042_p10 = scmp.ne.s32.totalorder %s5850_s9, %s5041_s23  ;;  %p5049_p13 = scmp.lt.s32.totalorder %s5850_s9, %s5850_s9 }
 0x1b7   : > { %p5050_p0 = scmp.lt.s32.totalorder %s5048_s20, %s5041_s23 }
 0x1b8   : > { %p5044_p11 = pnand %p5042_p10, %p5573_p7 }
 0x1b9   : > { %p5051_p2 = por %p5050_p0, %p5049_p13 }
 0x1ba   : > { %p5045_p12 = pneg %p5044_p11 }
 0x1bc   : > { %p5052_p4 = pnand %p5051_p2, %p5045_p12 }
 0x1be   : > { %5055 = shalt.err (!%p5052_p4)
}
 0x1bf   : > { %4341 = dma.hbm_to_vmem [thread:$0]  (!%p5559_p5), %s6628_s12, 16, %s5850_s9, [#allocation23]  }
 0x1c0   : > { %s5348_s25 = smov [#allocation27]   ;;  %s5349_s3 = smov [#allocation30]  }
 0x1c1   : > { %s749_s5 = sshll.u32 %s5348_s25, 4  ;;  %s773_s30 = sshll.u32 %s5349_s3, 4  ;;  %s750_s5 = int_to_ptr.vmem [resolvable:$true] %s749_s5  ;;  %s5894_s30 = int_to_ptr.vmem [resolvable:$true] %s773_s30 }
 0x1c2   : > { %s6629_s14 = sld [smem:[#allocation69_spill]] }
 0x1c8   : > { %s5056_s13 = scalar_lea.hbm %s6629_s14, 32 }
 0x1c9   : > { %p5057_p1 = scmp.ne.s32.totalorder %s6629_s14, %s5056_s13  ;;  %p5063_p8 = scmp.lt.u32.totalorder %s5056_s13, %s6629_s14 }
 0x1cb   : > { %p5059_p3 = pnand %p5057_p1, %p5573_p7 }
 0x1cd   : > { %p5060_p6 = pneg %p5059_p3 }
 0x1cf   : > { %p5065_p9 = pnand %p5063_p8, %p5060_p6 }
 0x1d1   : > { %5068 = shalt.err (!%p5065_p9)
}
 0x1d2   : > { %s5069_s11 = scalar_lea.vmem %s750_s5, 32  ;;  %p5077_p13 = scmp.lt.s32.totalorder %s750_s5, %s750_s5 }
 0x1d3   : > { %p5070_p10 = scmp.ne.s32.totalorder %s750_s5, %s5069_s11  ;;  %p5078_p0 = scmp.lt.s32.totalorder %s5069_s11, %s5069_s11 }
 0x1d5   : > { %p5072_p11 = pnand %p5070_p10, %p5573_p7  ;;  %p5079_p2 = por %p5078_p0, %p5077_p13 }
 0x1d7   : > { %p5073_p12 = pneg %p5072_p11 }
 0x1d9   : > { %p5080_p4 = pnand %p5079_p2, %p5073_p12 }
 0x1db   : > { %5083 = shalt.err (!%p5080_p4)
}
 0x1dc   : > { %4347 = dma.hbm_to_vmem [thread:$0]  (!%p5559_p5), %s6629_s14, 32, %s750_s5, [#allocation26]  }
 0x1dd   : > { %s6630_s16 = sld [smem:[#allocation71_spill]] }
 0x1e3   : > { %s5084_s4 = scalar_lea.hbm %s6630_s16, 16 }
 0x1e4   : > { %p5085_p1 = scmp.ne.s32.totalorder %s6630_s16, %s5084_s4  ;;  %p5091_p8 = scmp.lt.u32.totalorder %s5084_s4, %s6630_s16 }
 0x1e6   : > { %p5087_p3 = pnand %p5085_p1, %p5573_p7 }
 0x1e8   : > { %p5088_p6 = pneg %p5087_p3 }
 0x1ea   : > { %p5093_p9 = pnand %p5091_p8, %p5088_p6 }
 0x1ec   : > { %5096 = shalt.err (!%p5093_p9)
}
 0x1ed   : > { %s5097_s5 = scalar_lea.vmem %s5894_s30, 16  ;;  %s5104_s9 = scalar_lea.vmem %s5894_s30, 32 }
 0x1ee   : > { %p5098_p10 = scmp.ne.s32.totalorder %s5894_s30, %s5097_s5  ;;  %p5105_p13 = scmp.lt.s32.totalorder %s5894_s30, %s5894_s30 }
 0x1ef   : > { %p5106_p0 = scmp.lt.s32.totalorder %s5104_s9, %s5097_s5 }
 0x1f0   : > { %p5100_p11 = pnand %p5098_p10, %p5573_p7 }
 0x1f1   : > { %p5107_p2 = por %p5106_p0, %p5105_p13 }
 0x1f2   : > { %p5101_p12 = pneg %p5100_p11 }
 0x1f4   : > { %p5108_p4 = pnand %p5107_p2, %p5101_p12 }
 0x1f6   : > { %5111 = shalt.err (!%p5108_p4)
}
 0x1f7   : > { %4353 = dma.hbm_to_vmem [thread:$0]  (!%p5559_p5), %s6630_s16, 16, %s5894_s30, [#allocation29]  }
 0x1f8   : > { %s5350_s25 = smov [#allocation31]   ;;  %s5112_s13 = scalar_lea.hbm %s6527_s19, 1024 }
 0x1f9   : > { %s789_s3 = sshll.u32 %s5350_s25, 4  ;;  %p5113_p1 = scmp.ne.s32.totalorder %s6527_s19, %s5112_s13  ;;  %s790_s3 = int_to_ptr.vmem [resolvable:$true] %s789_s3 }
 0x1fa   : > { %p5119_p8 = scmp.lt.u32.totalorder %s5112_s13, %s6527_s19 }
 0x1fb   : > { %p5115_p3 = pnand %p5113_p1, %p5573_p7 }
 0x1fd   : > { %p5116_p6 = pneg %p5115_p3 }
 0x1ff   : > { %p5121_p9 = pnand %p5119_p8, %p5116_p6 }
 0x201   : > { %5124 = shalt.err (!%p5121_p9)
}
 0x202   : > { %s5125_s30 = scalar_lea.vmem %s790_s3, 1024  ;;  %p5133_p13 = scmp.lt.s32.totalorder %s790_s3, %s790_s3 }
 0x203   : > { %p5126_p10 = scmp.ne.s32.totalorder %s790_s3, %s5125_s30  ;;  %p5134_p0 = scmp.lt.s32.totalorder %s5125_s30, %s5125_s30 }
 0x205   : > { %p5128_p11 = pnand %p5126_p10, %p5573_p7  ;;  %p5135_p2 = por %p5134_p0, %p5133_p13 }
 0x207   : > { %p5129_p12 = pneg %p5128_p11 }
 0x209   : > { %p5136_p4 = pnand %p5135_p2, %p5129_p12 }
 0x20b   : > { %5139 = shalt.err (!%p5136_p4)
}
 0x20c   : > { %s6631_s15 = sld [smem:[#allocation50_spill]]  ;;  %s6632_s0 = sld [smem:[#allocation49_spill]] }
 0x20d   : > { %s6633_s25 = sld [smem:[#allocation48_spill]]  ;;  %s6634_s24 = sld [smem:[#allocation53_spill]] }
 0x20e   : > { %s6635_s4 = sld [smem:[#allocation47_spill]]  ;;  %s3795_s22 = sadd.s32 4294967294, %s5328_s7  }
 0x20f   : > { %4356 = dma.hbm_to_vmem [thread:$0]  (!%p5559_p5), %s6527_s19, 1024, %s790_s3, [#allocation32], %s6613_s26, %s6613_s26, %s6612_s18  }
 0x210   : > { %s6636_s13 = sld [smem:[#allocation46_spill]]  ;;  %s57_s1 = sadd.s32 1, %s5320_s6 }
 0x211   : > { %s60_s23 = sadd.s32 1, %s5324_s27  ;;  %p58_p7 = scmp.ge.s32.totalorder %s57_s1, 2 }
 0x212   : > { %s6637_s20 = sld [smem:[#allocation45_spill]]  ;;  %s67_s5 = sadd.s32 1, %s6631_s15 }
 0x213   : > { %p74_p1 = scmp.ne.s32.totalorder %s6631_s15, %s6632_s0  ;;  %p75_p3 = scmp.eq.s32.totalorder %s5328_s7, 0 }
 0x214   : > { %s6683_s1 = smov (%p58_p7, %s57_s1), 0  ;;  %s6685_s23 = smov (!%p58_p7, %s60_s23), %s5324_s27 }
 0x215   : > { %p5969_p6 = por %p75_p3, %p74_p1  ;;  %p80_p5 = scmp.ne.s32.totalorder %s6632_s0, %s6633_s25 }
 0x216   : > { %p62_p8 = scmp.ge.s32.totalorder %s6685_s23, 2  ;;  %s553_s26 = ssub.s32 %s5320_s6, %s6683_s1 }
 0x217   : > { %p6639_p9 = scmp.ne.s32.totalorder %s6634_s24, 0  ;;  %s557_s30 = sadd.s32 1, %s6635_s4 }
 0x218   : > { %s6687_s23 = smov (%p62_p8, %s6685_s23), 0  ;;  %p567_p11 = scmp.ne.s32.totalorder %s6635_s4, %s6636_s13 }
 0x219   : > { %p5979_p10 = por %p6639_p9, %p80_p5  ;;  %s6641_s9 = sadd.s32 4294967295, %s5328_s7  }
 0x21a   : > { %p568_p12 = scmp.eq.s32.totalorder %s6641_s9, 3  ;;  %s64_s11 = ssub.s32 %s5324_s27, %s6687_s23 }
 0x21b   : > { %p573_p13 = scmp.ne.s32.totalorder %s6636_s13, %s6637_s20  ;;  %p65_p0 = scmp.eq.s32.totalorder %s64_s11, 0 }
 0x21c   : > { %s554_s0 = sor.u32 %s553_s26, %s64_s11  ;;  %p5994_p4 = por %p568_p12, %p567_p11 }
 0x21d   : > { %p555_p2 = scmp.eq.s32.totalorder %s554_s0, 0  ;;  %p574_p7 = scmp.eq.s32.totalorder %s3795_s22, 3 }
 0x21e   : > { %s6642_s25 = scalar_select %p5994_p4, 1, 0 }
 0x21f   : > { %s5999_s24 = scalar_select %p65_p0, %s6631_s15, %s67_s5  }
 0x220   : > { %s6689_s4 = smov (!%p555_p2, %s6635_s4), %s557_s30  ;;  %p4382_p1 = scmp.lt.s32.totalorder %s5328_s7, 4 }
 0x221   : > { %s812_s8 = sand.u32 1, %s6631_s15   ;;  %s3972_s10 = sshll.u32 %s5324_s27, 8 }
 0x222   : > { %p6007_p3 = por %p574_p7, %p573_p13  ;;  %s3815_s13 = sshll.u32 %s812_s8, 4 }
 0x223   : > { %s6644_s11 = sld [smem:[#allocation55_spill]]  ;;  %p6018_p5 = pnand %p4382_p1, %p5969_p6 }
 0x224   : > { %s6643_s9 = scalar_select %p6007_p3, 1, 0 }
 0x225   : > { %s816_s15 = scalar_lea.vmem [#allocation4], %s3815_s13  ;;  %s6024_s30 = scalar_lea.sflag [#allocation5], %s812_s8 }
 0x226   : > { %s823_s5 = sshll.u32 %s816_s15, 4  ;;  %p5142_p9 = pneg %p6018_p5  ;;  %s6022_s5 = int_to_ptr.vmem [resolvable:$true] %s823_s5 }
 0x229   : > { %s6014_s0 = scalar_lea.hbm %s6644_s11, %s3972_s10  ;;  %s5145_s26 = scalar_lea.hbm %s6644_s11, 512 }
 0x22a   : > { %s5140_s20 = scalar_lea.hbm %s6014_s0, 256  ;;  %p5146_p6 = scmp.lt.u32.totalorder %s6014_s0, %s6644_s11 }
 0x22b   : > { %p5141_p8 = scmp.ne.s32.totalorder %s6014_s0, %s5140_s20  ;;  %p5147_p13 = scmp.lt.u32.totalorder %s5145_s26, %s5140_s20 }
 0x22c   : > { %p5149_p2 = scmp.lt.u32.totalorder %s5140_s20, %s6014_s0 }
 0x22d   : > { %p5143_p11 = pnand %p5142_p9, %p5141_p8  ;;  %p5148_p0 = por %p5147_p13, %p5146_p6 }
 0x22f   : > { %p5144_p12 = pneg %p5143_p11  ;;  %p5150_p7 = por %p5149_p2, %p5148_p0 }
 0x231   : > { %p5151_p1 = pnand %p5150_p7, %p5144_p12 }
 0x233   : > { %5154 = shalt.err (!%p5151_p1)
}
 0x234   : > { %s5155_s8 = scalar_lea.vmem %s6022_s5, 256  ;;  %s5351_s13 = smov [#allocation4]  }
 0x235   : > { %p5156_p8 = scmp.ne.s32.totalorder %s6022_s5, %s5155_s8  ;;  %s5160_s15 = sshll.u32 %s5351_s13, 4  ;;  %s5161_s15 = int_to_ptr.vmem [resolvable:$false] %s5160_s15 }
 0x236   : > { %s5162_s12 = scalar_lea.vmem %s5161_s15, 512  ;;  %p5163_p4 = scmp.lt.s32.totalorder %s6022_s5, %s5161_s15 }
 0x237   : > { %p5158_p11 = pnand %p5156_p8, %p5142_p9  ;;  %p5164_p6 = scmp.lt.s32.totalorder %s5162_s12, %s5155_s8 }
 0x239   : > { %p5159_p3 = pneg %p5158_p11  ;;  %p5165_p13 = por %p5164_p6, %p5163_p4 }
 0x23b   : > { %p5166_p0 = pnand %p5165_p13, %p5159_p3 }
 0x23d   : > { %5169 = shalt.err (!%p5166_p0)
}
 0x23e   : > { %4360 = dma.hbm_to_vmem [thread:$0]  (!%p6018_p5), %s6014_s0, 256, %s6022_s5, %s6024_s30, %s6619_s21, %s6619_s21, %s6618_s2  }
 0x23f   : > { %s6646_s14 = sld [smem:[#allocation54_spill]] }
 0x245   : > { %p6647_p9 = scmp.ne.s32.totalorder %s6646_s14, 0 }
 0x246   : > { %s6648_s20 = sld [smem:[#allocation49_spill]] (!%p6647_p9) }
 0x247   : > { %835 = sbr.rel (%p6647_p9) target bundleno = 4540 (0x11bc), region = 112 }
 0x24c   : > { %s837_s10 = sand.u32 (!%p6647_p9), 1, %s6648_s20  }
 0x24d   : > { %s3819_s18 = sshll.u32 (!%p6647_p9), %s837_s10, 4  ;;  %s838_s26 = scalar_lea.sflag (!%p6647_p9), [#allocation5], %s837_s10 }
 0x24e   : > { %s6058_s8 = scalar_lea.vmem [#allocation4], %s3819_s18 }
 0x24f   : > { %5243 = dma.done.wait (%p5979_p10), %s838_s26, 256  }
 0x250   : > { %5245 = vsyncadd (%p5979_p10), %s838_s26, 4294967040  ;;  %s6649_s22 = sld [smem:[#allocation53_spill]] }
 0x256   : > { %p6650_p4 = scmp.ne.s32.totalorder %s6649_s22, 0 }
 0x258   : > { %5247 = dma.done.wait (%p6650_p4), [#allocation8], 1040  }
 0x259   : > { %5249 = vsyncadd (%p6650_p4), [#allocation8], 4294966256 }
 0x25a   : > { %5251 = dma.done.wait (%p6650_p4), [#allocation11], 2080  }
 0x25b   : > { %5253 = vsyncadd (%p6650_p4), [#allocation11], 4294965216 }
 0x25c   : > { %5255 = dma.done.wait (%p6650_p4), [#allocation14], 1040  }
 0x25d   : > { %5257 = vsyncadd (%p6650_p4), [#allocation14], 4294966256 }
 0x25e   : > { %5259 = dma.done.wait (%p6650_p4), [#allocation17], 1040  }
 0x25f   : > { %5261 = vsyncadd (%p6650_p4), [#allocation17], 4294966256 }
 0x260   : > { %5263 = dma.done.wait (%p6650_p4), [#allocation20], 1040  }
 0x261   : > { %5265 = vsyncadd (%p6650_p4), [#allocation20], 4294966256 }
 0x262   : > { %5267 = dma.done.wait (%p6650_p4), [#allocation23], 32  }
 0x263   : > { %5269 = vsyncadd (%p6650_p4), [#allocation23], 4294967264 }
 0x264   : > { %5271 = dma.done.wait (%p6650_p4), [#allocation26], 2080  }
 0x265   : > { %5273 = vsyncadd (%p6650_p4), [#allocation26], 4294965216 }
 0x266   : > { %5275 = dma.done.wait (%p6650_p4), [#allocation29], 2064  }
 0x267   : > { %5277 = vsyncadd (%p6650_p4), [#allocation29], 4294965232 }
 0x268   : > { %5279 = dma.done.wait (%p6650_p4), [#allocation32], 1024  }
 0x269   : > { %5281 = vsyncadd (%p6650_p4), [#allocation32], 4294966272  ;;  %s6651_s2 = sld [smem:[#allocation46_spill]]  ;;  %s6652_s5 = sld [smem:[#allocation51_spill]] }
 0x26f   : > { %s6568_s21 = sand.u32 1, %s6651_s2   ;;  %p3838_p10 = scmp.ne.s32.totalorder %s6652_s5, 0 }
 0x270   : > { %s6103_s3 = sshll.u32 %s6568_s21, 3  ;;  %v4524_v0 = vld [vmem:[#allocation10 + $0x4] ss:$8 sps:$4 sm:$0xff] (!%p3838_p10)   ;;  %v4526_v1 = vld [vmem:[#allocation10] ss:$8 sps:$4 sm:$0xff] (!%p3838_p10)   ;;  %v5352_v2 = vmov (!%p3838_p10), 0   ;;  %v998_v20 = vlaneseq (!%p3838_p10) }
 0x271   : > { %s971_s0 = scalar_lea.vmem [#allocation33], %s6103_s3  ;;  %976 = sbr.rel (%p3838_p10) target bundleno = 1040 (0x410), region = 188  ;;  %1120 = vmatprep.mubr.bf16.mxu0 (!%p3838_p10), %v5352_v2  ;;  %1088 = vmatprep.subr.bf16.mxu0 (!%p3838_p10), %v4524_v0  ;;  %v4527_v3 = vld [vmem:[#allocation10 + $0x14] ss:$8 sps:$4 sm:$0xff] (!%p3838_p10)   ;;  %v4529_v4 = vld [vmem:[#allocation10 + $0x10] ss:$8 sps:$4 sm:$0xff] (!%p3838_p10)  }
 0x272   : > { %1089 = vmatpush1.bf16.msra.mxu0 (!%p3838_p10), %v4526_v1  ;;  %v4530_v5 = vld [vmem:[#allocation10 + $0x24] ss:$8 sps:$4 sm:$0xff] (!%p3838_p10)   ;;  %v4532_v6 = vld [vmem:[#allocation10 + $0x20] ss:$8 sps:$4 sm:$0xff] (!%p3838_p10)   ;;  %v4533_v7 = vld [vmem:[#allocation10 + $0x34] ss:$8 sps:$4 sm:$0xff] (!%p3838_p10)  }
 0x273   : > { %1090 = vmatprep.subr.bf16.mxu0 (!%p3838_p10), %v4527_v3  ;;  %v4535_v8 = vld [vmem:[#allocation10 + $0x30] ss:$8 sps:$4 sm:$0xff] (!%p3838_p10)   ;;  %v4536_v9 = vld [vmem:[#allocation10 + $0x44] ss:$8 sps:$4 sm:$0xff] (!%p3838_p10)   ;;  %v4538_v10 = vld [vmem:[#allocation10 + $0x40] ss:$8 sps:$4 sm:$0xff] (!%p3838_p10)  }
 0x274   : > { %v4539_v11 = vld [vmem:[#allocation10 + $0x54] ss:$8 sps:$4 sm:$0xff] (!%p3838_p10)   ;;  %v4541_v12 = vld [vmem:[#allocation10 + $0x50] ss:$8 sps:$4 sm:$0xff] (!%p3838_p10)   ;;  %v4542_v13 = vld [vmem:[#allocation10 + $0x64] ss:$8 sps:$4 sm:$0xff] (!%p3838_p10)  }
 0x275   : > { %v4544_v14 = vld [vmem:[#allocation10 + $0x60] ss:$8 sps:$4 sm:$0xff] (!%p3838_p10)   ;;  %v4545_v15 = vld [vmem:[#allocation10 + $0x74] ss:$8 sps:$4 sm:$0xff] (!%p3838_p10)   ;;  %v4547_v16 = vld [vmem:[#allocation10 + $0x70] ss:$8 sps:$4 sm:$0xff] (!%p3838_p10)  }
 0x276   : > { %1091 = vmatpush1.bf16.msra.mxu0 (!%p3838_p10), %v4529_v4  ;;  %v977_v17 = vld [vmem:[%s6058_s8] sm:$0xff] (!%p3838_p10)  ;;  %v978_v18 = vld [vmem:[%s6058_s8 + $0x8] sm:$0xff] (!%p3838_p10)  ;;  %v999_v21 = vshrl.u32 (!%p3838_p10), %v998_v20, 7  ;;  %s5353_s30 = smov (!%p3838_p10), 64   ;;  %s5354_s13 = smov (!%p3838_p10), 96   ;;  %vm1427_vm0 = vcmask (!%p3838_p10), 261120  }
 0x277   : > { %1092 = vmatprep.subr.bf16.mxu0 (!%p3838_p10), %v4530_v5  ;;  %v979_v19 = vpack.c.bf16 (!%p3838_p10), %v978_v18, %v977_v17  ;;  %v996_v23 = vld [vmem:[#allocation12] sm:$0x3] (!%p3838_p10)  ;;  %s5355_s15 = smov (!%p3838_p10), 32   ;;  %v5356_v35 = vmov (!%p3838_p10), 1983009808  }
 0x278   : > { %v1000_v22 = vsub.s32 0, %v999_v21  ;;  %v1004_v27 = vsub.s32 1, %v999_v21  ;;  %v1154_v36 = vunpack.c.l.s4 %v5356_v35  ;;  %v5357_v37 = vmov 1934713408  }
 0x279   : > { %v1186_v38 = vunpack.c.l.s4 %v5357_v37 }
 0x27a   : > { %1093 = vmatpush1.bf16.msra.mxu0 %v4532_v6  ;;  %v1001_v24 = vrot.slane %v996_v23, %v1000_v22  ;;  %v1005_v31 = vrot.slane %v996_v23, %v1004_v27  ;;  %v1155_v39 = vunpack.c.0.s8 %v1154_v36 }
 0x27b   : > { %1094 = vmatprep.subr.bf16.mxu0 %v4533_v7  ;;  %v1187_v42 = vunpack.c.0.s8 %v1186_v38 }
 0x27c   : > { %v6124_v43 = vsub.s32 %v1155_v39, %v999_v21 }
 0x27d   : > { %v6126_v50 = vsub.s32 %v1187_v42, %v999_v21 }
 0x27e   : > { %1095 = vmatpush1.bf16.msra.mxu0 %v4535_v8 }
 0x27f   : > { %1096 = vmatprep.subr.bf16.mxu0 %v4536_v9 }
 0x282   : > { %1097 = vmatpush1.bf16.msra.mxu0 %v4538_v10 }
 0x283   : > { %1098 = vmatprep.subr.bf16.mxu0 %v4539_v11 }
 0x286   : > { %1099 = vmatpush1.bf16.msra.mxu0 %v4541_v12 }
 0x287   : > { %1100 = vmatprep.subr.bf16.mxu0 %v4542_v13 }
 0x28a   : > { %1101 = vmatpush1.bf16.msra.mxu0 %v4544_v14 }
 0x28b   : > { %1102 = vmatprep.subr.bf16.mxu0 %v4545_v15 }
 0x28e   : > { %1103 = vmatpush1.bf16.msra.mxu0 %v4547_v16 }
 0x291   : > { %1121 = vmatmul.mubr.bf16.vlgmr.msra.gmra.mrb[0].mxu0 %v979_v19 }
 0x364   : > { %v1122_v25 = vpop.f32.mrb[0].mxu0 }
 0x365   : > { %v1123_v26 = vadd.f32 %v1122_v25, %v1001_v24  ;;  %v1124_v28 = vpop.f32.mrb[1].mxu0 }
 0x366   : > { %v1126_v29 = vpop.f32.mrb[2].mxu0  ;;  %v6112_v33 = vadd.f32 %v1124_v28, %v1005_v31 }
 0x367   : > { %v1128_v30 = vpop.f32.mrb[3].mxu0  ;;  %1139 = vrot.lane.b32.xlu1 %v1123_v26, %s5353_s30  ;;  %1133 = vrot.lane.b32.xlu0 %v1123_v26, %s5354_s13  ;;  %v6109_v32 = vadd.f32 %v1126_v29, %v1001_v24 }
 0x368   : > { %v6116_v34 = vadd.f32 %v1128_v30, %v1005_v31 }
 0x36b   : > { %1141 = vrot.lane.b32.xlu1 %v6109_v32, %s5353_s30  ;;  %1145 = vrot.lane.b32.xlu0 %v1123_v26, %s5355_s15 }
 0x36f   : > { %1147 = vrot.lane.b32.xlu1 %v6109_v32, %s5355_s15  ;;  %1434 = vrot.lane.b32.xlu0 %v6112_v33, %s5354_s13 }
 0x373   : > { %1436 = vrot.lane.b32.xlu1 %v6116_v34, %s5354_s13  ;;  %1440 = vrot.lane.b32.xlu0 %v6112_v33, %s5353_s30 }
 0x377   : > { %1442 = vrot.lane.b32.xlu1 %v6116_v34, %s5353_s30  ;;  %1135 = vrot.lane.b32.xlu0 %v6109_v32, %s5354_s13 }
 0x37b   : > { %1448 = vrot.lane.b32.xlu1 %v6116_v34, %s5355_s15  ;;  %1446 = vrot.lane.b32.xlu0 %v6112_v33, %s5355_s15 }
 0x3d9   : > { %v1140_v40 = vpop.permute.xlu1 %1139  ;;  %v1134_v41 = vpop.permute.xlu0 %1133 }
 0x3da   : > { %v1151_v44 = vcombine.low %v1123_v26, %v1140_v40  ;;  %v1152_v45 = vcombine.high %v1123_v26, %v1140_v40 }
 0x3dc   : > { %v1159_v51 = vrot.slane %v1151_v44, %v6124_v43  ;;  %v1166_v52 = vrot.slane %v1152_v45, %v6124_v43 }
 0x3dd   : > { %v1142_v46 = vpop.permute.xlu1 %1141  ;;  %v1146_v47 = vpop.permute.xlu0 %1145 }
 0x3de   : > { %v1167_v48 = vcombine.low %v1134_v41, %v1146_v47  ;;  %v1168_v49 = vcombine.high %v1134_v41, %v1146_v47  ;;  %v1219_v7 = vcombine.low %v6109_v32, %v1142_v46  ;;  %v1220_v8 = vcombine.high %v6109_v32, %v1142_v46 }
 0x3e0   : > { %v1175_v53 = vrot.slane %v1167_v48, %v6124_v43  ;;  %v1182_v54 = vrot.slane %v1168_v49, %v6124_v43  ;;  %v1227_v25 = vrot.slane %v1219_v7, %v6124_v43  ;;  %v1234_v26 = vrot.slane %v1220_v8, %v6124_v43 }
 0x3e1   : > { %v1148_v55 = vpop.permute.xlu1 %1147  ;;  %v6132_v56 = vpop.permute.xlu0 %1434 }
 0x3e2   : > { %v1183_v57 = vcombine.low %v1159_v51, %v1175_v53  ;;  %v1184_v58 = vcombine.high %v1159_v51, %v1175_v53  ;;  %v1199_v59 = vcombine.low %v1166_v52, %v1182_v54  ;;  %v1200_v60 = vcombine.high %v1166_v52, %v1182_v54 }
 0x3e4   : > { %v1191_v61 = vrot.slane %v1183_v57, %v6126_v50  ;;  %v1198_v62 = vrot.slane %v1184_v58, %v6126_v50  ;;  %v1207_v63 = vrot.slane %v1199_v59, %v6126_v50  ;;  %v1214_v0 = vrot.slane %v1200_v60, %v6126_v50 }
 0x3e5   : > { %v1437_v1 = vpop.permute.xlu1 %1436  ;;  %v1441_v2 = vpop.permute.xlu0 %1440 }
 0x3e6   : > { %v1287_v3 = vcombine.low %v1191_v61, %v1198_v62  ;;  %v3855_v4 = vcombine.high %v1191_v61, %v1198_v62  ;;  %v1303_v5 = vcombine.low %v1207_v63, %v1214_v0  ;;  %v3856_v6 = vcombine.high %v1207_v63, %v1214_v0 }
 0x3e7   : > { %v1452_v13 = vcombine.low %v6112_v33, %v1441_v2  ;;  %v1453_v14 = vcombine.high %v6112_v33, %v1441_v2 }
 0x3e8   : > { %v1294_v9 = vrot.slane %v1287_v3, %v6124_v43  ;;  %v1302_v10 = vrot.slane %v3855_v4, %v6124_v43  ;;  %v1310_v11 = vrot.slane %v1303_v5, %v6124_v43  ;;  %v1318_v12 = vrot.slane %v3856_v6, %v6124_v43 }
 0x3e9   : > { %v1443_v15 = vpop.permute.xlu1 %1442  ;;  %v1136_v16 = vpop.permute.xlu0 %1135  ;;  %v6157_v29 = vrot.slane %v1452_v13, %v6124_v43  ;;  %v6160_v30 = vrot.slane %v1453_v14, %v6124_v43 }
 0x3ea   : > { %v1319_v17 = vcombine.low %v1294_v9, %v1302_v10  ;;  %v1320_v18 = vcombine.high %v1294_v9, %v1302_v10  ;;  %v1335_v19 = vcombine.low %v1310_v11, %v1318_v12  ;;  %v1336_v20 = vcombine.high %v1310_v11, %v1318_v12 }
 0x3eb   : > { %v1520_v21 = vcombine.low %v6116_v34, %v1443_v15  ;;  %v1521_v22 = vcombine.high %v6116_v34, %v1443_v15  ;;  %v1235_v23 = vcombine.low %v1136_v16, %v1148_v55  ;;  %v1236_v24 = vcombine.high %v1136_v16, %v1148_v55 }
 0x3ec   : > { %v6151_v27 = vrot.slane %v1319_v17, %v6126_v50  ;;  %v6154_v28 = vrot.slane %v1335_v19, %v6126_v50  ;;  %v6165_v34 = vrot.slane %v1320_v18, %v6126_v50  ;;  %v6168_v35 = vrot.slane %v1336_v20, %v6126_v50 }
 0x3ed   : > { %v1243_v31 = vrot.slane %v1235_v23, %v6124_v43  ;;  %v1250_v32 = vrot.slane %v1236_v24, %v6124_v43  ;;  %v1449_v33 = vpop.permute.xlu1 %1448  ;;  %v1528_v36 = vrot.slane %v1520_v21, %v6124_v43  ;;  %v1535_v37 = vrot.slane %v1521_v22, %v6124_v43  ;;  %v1447_v42 = vpop.permute.xlu0 %1446 }
 0x3ee   : > { %v1351_v44 = vcombine.low %v6151_v27, %v6154_v28  ;;  %v1352_v45 = vcombine.high %v6151_v27, %v6154_v28  ;;  %v1536_v46 = vcombine.low %v1437_v1, %v1449_v33  ;;  %v1537_v47 = vcombine.high %v1437_v1, %v1449_v33 }
 0x3ef   : > { %v1251_v38 = vcombine.low %v1227_v25, %v1243_v31  ;;  %v1252_v39 = vcombine.high %v1227_v25, %v1243_v31  ;;  %v1267_v40 = vcombine.low %v1234_v26, %v1250_v32  ;;  %v1268_v41 = vcombine.high %v1234_v26, %v1250_v32 }
 0x3f0   : > { %v1544_v53 = vrot.slane %v1536_v46, %v6124_v43  ;;  %v1551_v54 = vrot.slane %v1537_v47, %v6124_v43  ;;  %v1468_v55 = vcombine.low %v6132_v56, %v1447_v42  ;;  %v1469_v57 = vcombine.high %v6132_v56, %v1447_v42 }
 0x3f1   : > { %v1259_v48 = vrot.slane %v1251_v38, %v6126_v50  ;;  %v1266_v49 = vrot.slane %v1252_v39, %v6126_v50  ;;  %v1275_v51 = vrot.slane %v1267_v40, %v6126_v50  ;;  %v1282_v52 = vrot.slane %v1268_v41, %v6126_v50 }
 0x3f2   : > { %v1552_v62 = vcombine.low %v1528_v36, %v1544_v53  ;;  %v1553_v63 = vcombine.high %v1528_v36, %v1544_v53  ;;  %v1568_v0 = vcombine.low %v1535_v37, %v1551_v54  ;;  %v1569_v1 = vcombine.high %v1535_v37, %v1551_v54 }
 0x3f3   : > { %v1355_v58 = vcombine.low %v1259_v48, %v1266_v49  ;;  %v3857_v59 = vcombine.high %v1259_v48, %v1266_v49  ;;  %v1371_v60 = vcombine.low %v1275_v51, %v1282_v52  ;;  %v3858_v61 = vcombine.high %v1275_v51, %v1282_v52 }
 0x3f4   : > { %v1560_v6 = vrot.slane %v1552_v62, %v6126_v50  ;;  %v1567_v56 = vrot.slane %v1553_v63, %v6126_v50  ;;  %v1576_v7 = vrot.slane %v1568_v0, %v6126_v50  ;;  %v1583_v8 = vrot.slane %v1569_v1, %v6126_v50 }
 0x3f5   : > { %v1362_v2 = vrot.slane %v1355_v58, %v6124_v43  ;;  %v1370_v3 = vrot.slane %v3857_v59, %v6124_v43  ;;  %v1378_v4 = vrot.slane %v1371_v60, %v6124_v43  ;;  %v1386_v5 = vrot.slane %v3858_v61, %v6124_v43 }
 0x3f6   : > { %v1656_v13 = vcombine.low %v1560_v6, %v1567_v56  ;;  %v3861_v14 = vcombine.high %v1560_v6, %v1567_v56  ;;  %v1672_v15 = vcombine.low %v1576_v7, %v1583_v8  ;;  %v3862_v16 = vcombine.high %v1576_v7, %v1583_v8 }
 0x3f7   : > { %v1387_v9 = vcombine.low %v1362_v2, %v1370_v3  ;;  %v1388_v10 = vcombine.high %v1362_v2, %v1370_v3  ;;  %v1403_v11 = vcombine.low %v1378_v4, %v1386_v5  ;;  %v1404_v12 = vcombine.high %v1378_v4, %v1386_v5 }
 0x3f8   : > { %v1353_v21 = vcombine.low %v6165_v34, %v6168_v35  ;;  %v1354_v22 = vcombine.high %v6165_v34, %v6168_v35  ;;  %v1476_v23 = vrot.slane %v1468_v55, %v6124_v43  ;;  %v1483_v24 = vrot.slane %v1469_v57, %v6124_v43 }
 0x3f9   : > { %v1395_v17 = vrot.slane %v1387_v9, %v6126_v50  ;;  %v1402_v18 = vrot.slane %v1388_v10, %v6126_v50  ;;  %v1411_v19 = vrot.slane %v1403_v11, %v6126_v50  ;;  %v1418_v20 = vrot.slane %v1404_v12, %v6126_v50 }
 0x3fa   : > { %v1663_v31 = vrot.slane %v1656_v13, %v6124_v43  ;;  %v1671_v32 = vrot.slane %v3861_v14, %v6124_v43  ;;  %v1679_v33 = vrot.slane %v1672_v15, %v6124_v43  ;;  %v1687_v36 = vrot.slane %v3862_v16, %v6124_v43 }
 0x3fb   : > { %v1419_v25 = vcombine.low %v1395_v17, %v1411_v19  ;;  %v1420_v26 = vcombine.high %v1395_v17, %v1411_v19  ;;  %v1421_v27 = vcombine.low %v1402_v18, %v1418_v20  ;;  %v1422_v28 = vcombine.high %v1402_v18, %v1418_v20 }
 0x3fc   : > { %v1484_v35 = vcombine.low %v6157_v29, %v1476_v23  ;;  %v1485_v40 = vcombine.high %v6157_v29, %v1476_v23  ;;  %v1500_v41 = vcombine.low %v6160_v30, %v1483_v24  ;;  %v1501_v42 = vcombine.high %v6160_v30, %v1483_v24 }
 0x3fd   : > { %v1423_v37 = vpack.c.bf16 %v1419_v25, %v1351_v44  ;;  %v1424_v38 = vpack.c.bf16 %v1420_v26, %v1352_v45  ;;  %v1425_v39 = vpack.c.bf16 %v1421_v27, %v1353_v21  ;;  %v1426_v34 = vpack.c.bf16 %v1422_v28, %v1354_v22 }
 0x3fe   : > { %v1688_v44 = vcombine.low %v1663_v31, %v1671_v32  ;;  %v1689_v45 = vcombine.high %v1663_v31, %v1671_v32  ;;  %v1704_v46 = vcombine.low %v1679_v33, %v1687_v36  ;;  %v1705_v47 = vcombine.high %v1679_v33, %v1687_v36 }
 0x3ff   : > { %1428 = vst.msk [vmem:[#allocation2] sm:$0xff] %vm1427_vm0, %v1423_v37  ;;  %1429 = vst.msk [vmem:[#allocation2 + $0x8] sm:$0xff] %vm1427_vm0, %v1424_v38  ;;  %v1492_v48 = vrot.slane %v1484_v35, %v6126_v50  ;;  %v1499_v49 = vrot.slane %v1485_v40, %v6126_v50  ;;  %v1508_v51 = vrot.slane %v1500_v41, %v6126_v50 }
 0x400   : > { %1430 = vst.msk [vmem:[#allocation2 + $0x10] sm:$0xff] %vm1427_vm0, %v1425_v39  ;;  %1431 = vst.msk [vmem:[#allocation2 + $0x18] sm:$0xff] %vm1427_vm0, %v1426_v34  ;;  %v1515_v52 = vrot.slane %v1501_v42, %v6126_v50  ;;  %v1696_v57 = vrot.slane %v1688_v44, %v6126_v50  ;;  %v1703_v30 = vrot.slane %v1689_v45, %v6126_v50 }
 0x401   : > { %v1588_v53 = vcombine.low %v1492_v48, %v1499_v49  ;;  %v3859_v54 = vcombine.high %v1492_v48, %v1499_v49  ;;  %v1712_v58 = vrot.slane %v1704_v46, %v6126_v50  ;;  %v1719_v59 = vrot.slane %v1705_v47, %v6126_v50 }
 0x402   : > { %v1604_v55 = vcombine.low %v1508_v51, %v1515_v52  ;;  %v3860_v29 = vcombine.high %v1508_v51, %v1515_v52 }
 0x403   : > { %v1595_v60 = vrot.slane %v1588_v53, %v6124_v43  ;;  %v1603_v61 = vrot.slane %v3859_v54, %v6124_v43  ;;  %v1720_v4 = vcombine.low %v1696_v57, %v1712_v58  ;;  %v1721_v5 = vcombine.high %v1696_v57, %v1712_v58 }
 0x404   : > { %v1611_v62 = vrot.slane %v1604_v55, %v6124_v43  ;;  %v1619_v63 = vrot.slane %v3860_v29, %v6124_v43  ;;  %v1722_v6 = vcombine.low %v1703_v30, %v1719_v59  ;;  %v1723_v56 = vcombine.high %v1703_v30, %v1719_v59 }
 0x405   : > { %v1620_v0 = vcombine.low %v1595_v60, %v1603_v61  ;;  %v1621_v1 = vcombine.high %v1595_v60, %v1603_v61 }
 0x406   : > { %v1636_v2 = vcombine.low %v1611_v62, %v1619_v63  ;;  %v1637_v3 = vcombine.high %v1611_v62, %v1619_v63 }
 0x407   : > { %v1628_v7 = vrot.slane %v1620_v0, %v6126_v50  ;;  %v1635_v8 = vrot.slane %v1621_v1, %v6126_v50 }
 0x408   : > { %v1644_v9 = vrot.slane %v1636_v2, %v6126_v50  ;;  %v1651_v10 = vrot.slane %v1637_v3, %v6126_v50 }
 0x40a   : > { %v1652_v11 = vcombine.low %v1628_v7, %v1644_v9  ;;  %v1653_v12 = vcombine.high %v1628_v7, %v1644_v9  ;;  %v1654_v13 = vcombine.low %v1635_v8, %v1651_v10  ;;  %v1655_v43 = vcombine.high %v1635_v8, %v1651_v10 }
 0x40c   : > { %v1724_v14 = vpack.c.bf16 %v1720_v4, %v1652_v11  ;;  %v1725_v15 = vpack.c.bf16 %v1721_v5, %v1653_v12  ;;  %v1726_v16 = vpack.c.bf16 %v1722_v6, %v1654_v13  ;;  %v1727_v17 = vpack.c.bf16 %v1723_v56, %v1655_v43 }
 0x40e   : > { %1728 = vst.msk [vmem:[#allocation3] sm:$0xff] %vm1427_vm0, %v1724_v14  ;;  %1729 = vst.msk [vmem:[#allocation3 + $0x8] sm:$0xff] %vm1427_vm0, %v1725_v15 }
 0x40f   : > { %1730 = vst.msk [vmem:[#allocation3 + $0x10] sm:$0xff] %vm1427_vm0, %v1726_v16  ;;  %1731 = vst.msk [vmem:[#allocation3 + $0x18] sm:$0xff] %vm1427_vm0, %v1727_v17 }
 0x410 PF: > { %v4548_v18 = vld [vmem:[#allocation7] sm:$0xff]   ;;  %s6653_s12 = sld [smem:[#allocation51_spill]]  ;;  %v5358_v50 = vmov 0.0   ;;  %v4549_v19 = vld [vmem:[#allocation7 + $0x8] sm:$0xff]   ;;  %vm5359_vm1 = vmmov 0   ;;  %v4550_v20 = vld [vmem:[#allocation7 + $0x10] sm:$0xff]   ;;  %v1862_v40 = vlaneseq }
 0x411   : > { %4065 = vmatprep.subr.bf16.mxu0 %v5358_v50  ;;  %4085 = vmatprep.subr.bf16.mxu1 %v5358_v50  ;;  %v4551_v21 = vld [vmem:[#allocation7 + $0x18] sm:$0xff]   ;;  %v4552_v22 = vld [vmem:[#allocation7 + $0x20] sm:$0xff]   ;;  %v4553_v23 = vld [vmem:[#allocation7 + $0x28] sm:$0xff]   ;;  %s5360_s10 = smov 32   ;;  %s5361_s18 = smov 96   ;;  %vm2001_vm2 = vcmask 261120  }
 0x412   : > { %4066 = vmatpush3.bf16.msra.mxu0 %v4548_v18  ;;  %4081 = vmatprep.mubr.msk.bf16.mxu0 %vm5359_vm1, %v5358_v50  ;;  %v4554_v24 = vld [vmem:[#allocation7 + $0x30] sm:$0xff]   ;;  %v4555_v25 = vld [vmem:[#allocation7 + $0x38] sm:$0xff]   ;;  %v3864_v28 = vld [vmem:[#allocation9] ss:$0 sm:$0xff]  ;;  %s5362_s26 = smov 64   ;;  %v6261_v45 = vshrl.u32 %v1862_v40, 7 }
 0x413   : > { %4067 = vmatprep.subr.bf16.mxu0 %v5358_v50  ;;  %4087 = vmatprep.mubr.msk.bf16.mxu1 %vm5359_vm1, %v5358_v50  ;;  %v1997_v38 = vld [vmem:[#allocation2] sm:$0xff]  ;;  %v5363_v34 = vmov 1983009808   ;;  %v5364_v41 = vmov 1934713408   ;;  %v1998_v14 = vld [vmem:[#allocation2 + $0x8] sm:$0xff] }
 0x414   : > { %v2006_v39 = vsel %vm2001_vm2, %v1997_v38, 0  ;;  %v1860_v35 = vunpack.c.l.s4 %v5363_v34  ;;  %v1892_v42 = vunpack.c.l.s4 %v5364_v41  ;;  %v2052_v17 = vsel %vm2001_vm2, %v1998_v14, 0  ;;  %s6654_s2 = sld [smem:[#allocation72_spill]]  ;;  %s6658_s22 = sld [smem:[#allocation52_spill]] }
 0x415   : > { %4086 = vmatpush3.bf16.xpose.msra.mxu1 %v2006_v39  ;;  %vm2186_vm3 = vcmask 130048   ;;  %vm2560_vm4 = vcmask 523264   ;;  %vm2562_vm5 = vcmask 785408   ;;  %s3547_s21 = sshll.u32 %s971_s0, 4  ;;  %p6664_p5 = scmp.ne.s32.totalorder %s6642_s25, 0  ;;  %s6444_s21 = int_to_ptr.vmem [resolvable:$true] %s3547_s21 }
 0x416   : > { %4068 = vmatpush3.bf16.msra.mxu0 %v4549_v19  ;;  %s3863_s14 = sshll.u32 %s6653_s12, 3  ;;  %4091 = vmatprep.subr.bf16.mxu1 %v5358_v50  ;;  %v1861_v44 = vunpack.c.0.s8 %v1860_v35  ;;  %v1893_v48 = vunpack.c.0.s8 %v1892_v42  ;;  %s5170_s15 = scalar_lea.vmem %s6444_s21, 128 }
 0x417   : > { %4069 = vmatprep.subr.bf16.mxu0 %v5358_v50  ;;  %s1733_s20 = scalar_lea.vmem %s6058_s8, %s3863_s14 [#allocation4]  ;;  %s6657_s8 = sld [smem:[#allocation74_spill]] }
 0x418   : > { %v6248_v26 = vld [vmem:[%s1733_s20] sm:$0xff]  ;;  %v6264_v49 = vsub.s32 %v1861_v44, %v6261_v45  ;;  %v6267_v29 = vsub.s32 %v1893_v48, %v6261_v45  ;;  %s6660_s20 = sld [smem:[#allocation75_spill]]  ;;  %p5171_p3 = scmp.ne.s32.totalorder %s6444_s21, %s5170_s15 }
 0x419   : > { %v1752_v27 = vpack.c.bf16 %v6248_v26, %v6248_v26 }
 0x41a   : > { %4070 = vmatpush3.bf16.msra.mxu0 %v4550_v20  ;;  %s6655_s13 = smov %s6654_s2  ;;  %s3968_s5 = sshll.u32 %s6658_s22, 1 }
 0x41b   : > { %4071 = vmatprep.subr.bf16.mxu0 %v5358_v50  ;;  %s3543_s30 = sadd.s32 %s6653_s12, %s3968_s5  ;;  %s6662_s22 = sld [smem:[#allocation77_spill]] }
 0x41c   : > { %p5172_p12 = pnand %p5171_p3, %p6664_p5 }
 0x41e   : > { %4072 = vmatpush3.bf16.msra.mxu0 %v4551_v21  ;;  %v1999_v21 = vld [vmem:[#allocation2 + $0x10] sm:$0xff]  ;;  %p5173_p2 = pneg %p5172_p12 }
 0x41f   : > { %4073 = vmatprep.subr.bf16.mxu0 %v5358_v50 }
 0x422   : > { %4074 = vmatpush3.bf16.msra.mxu0 %v4552_v22 }
 0x423   : > { %4075 = vmatprep.subr.bf16.mxu0 %v5358_v50 }
 0x426   : > { %4076 = vmatpush3.bf16.msra.mxu0 %v4553_v23  ;;  %v2098_v23 = vsel %vm2001_vm2, %v1999_v21, 0 }
 0x427   : > { %4077 = vmatprep.subr.bf16.mxu0 %v5358_v50 }
 0x42a   : > { %4078 = vmatpush3.bf16.msra.mxu0 %v4554_v24 }
 0x42b   : > { %4079 = vmatprep.subr.bf16.mxu0 %v5358_v50 }
 0x42e   : > { %4080 = vmatpush3.bf16.msra.mxu0 %v4555_v25 }
 0x42f   : > { %4133 = vmatprep.subr.bf16.mxu0 %v5358_v50 }
 0x431   : > { %4082 = vmatmul.mubr.bf16.vlgmr.msra.gmra.mrb[0].mxu0 %v1752_v27 }
 0x432   : > { %4149 = vmatprep.mubr.msk.bf16.mxu0 %vm5359_vm1, %v5358_v50 }
 0x504   : > { %v1841_v31 = vpop.f32.mrb[0].mxu0 }
 0x505   : > { %v1842_v32 = vadd.f32 %v3864_v28, %v1841_v31  ;;  %v4083_v33 = vpop.f32.mrb[1].mxu0  ;;  %v2000_v28 = vld [vmem:[#allocation2 + $0x18] sm:$0xff] }
 0x506   : > { %v1844_v36 = vpop.f32.mrb[2].mxu0 }
 0x507   : > { %1854 = vrot.lane.b32.xlu1 %v1842_v32, %s5360_s10  ;;  %1848 = vrot.lane.b32.xlu0 %v1842_v32, %s5361_s18  ;;  %v4084_v37 = vpop.f32.mrb[3].mxu0 }
 0x50b   : > { %1851 = vrot.lane.b32.xlu0 %v1842_v32, %s5362_s26 }
 0x579   : > { %v1855_v46 = vpop.permute.xlu1 %1854  ;;  %v1849_v47 = vpop.permute.xlu0 %1848 }
 0x57a   : > { %v1873_v51 = vcombine.low %v1849_v47, %v1855_v46  ;;  %v1874_v52 = vcombine.high %v1849_v47, %v1855_v46 }
 0x57c   : > { %v1881_v57 = vrot.slane %v1873_v51, %v6264_v49  ;;  %v1888_v30 = vrot.slane %v1874_v52, %v6264_v49 }
 0x57d   : > { %v1852_v53 = vpop.permute.xlu0 %1851 }
 0x57e   : > { %v1857_v54 = vcombine.low %v1842_v32, %v1852_v53  ;;  %v1858_v55 = vcombine.high %v1842_v32, %v1852_v53  ;;  %v2144_v32 = vsel %vm2001_vm2, %v2000_v28, 0 }
 0x580   : > { %v1865_v58 = vrot.slane %v1857_v54, %v6264_v49  ;;  %v1872_v59 = vrot.slane %v1858_v55, %v6264_v49 }
 0x582   : > { %v1889_v60 = vcombine.low %v1865_v58, %v1881_v57  ;;  %v1890_v61 = vcombine.high %v1865_v58, %v1881_v57  ;;  %v1905_v62 = vcombine.low %v1872_v59, %v1888_v30  ;;  %v1906_v63 = vcombine.high %v1872_v59, %v1888_v30 }
 0x584   : > { %v1897_v0 = vrot.slane %v1889_v60, %v6267_v29  ;;  %v1904_v1 = vrot.slane %v1890_v61, %v6267_v29  ;;  %v1913_v2 = vrot.slane %v1905_v62, %v6267_v29  ;;  %v1920_v3 = vrot.slane %v1906_v63, %v6267_v29 }
 0x586   : > { %v1925_v4 = vcombine.low %v1897_v0, %v1904_v1  ;;  %v3873_v5 = vcombine.high %v1897_v0, %v1904_v1  ;;  %v1941_v6 = vcombine.low %v1913_v2, %v1920_v3  ;;  %v3874_v56 = vcombine.high %v1913_v2, %v1920_v3 }
 0x588   : > { %v1932_v7 = vrot.slane %v1925_v4, %v6264_v49  ;;  %v1940_v8 = vrot.slane %v3873_v5, %v6264_v49  ;;  %v1948_v9 = vrot.slane %v1941_v6, %v6264_v49  ;;  %v1956_v10 = vrot.slane %v3874_v56, %v6264_v49 }
 0x58a   : > { %v1957_v11 = vcombine.low %v1932_v7, %v1940_v8  ;;  %v1973_v12 = vcombine.low %v1948_v9, %v1956_v10  ;;  %v1958_v18 = vcombine.high %v1932_v7, %v1940_v8  ;;  %v1974_v19 = vcombine.high %v1948_v9, %v1956_v10 }
 0x58c   : > { %v1965_v13 = vrot.slane %v1957_v11, %v6267_v29  ;;  %v1981_v43 = vrot.slane %v1973_v12, %v6267_v29  ;;  %v1972_v24 = vrot.slane %v1958_v18, %v6267_v29  ;;  %v1988_v25 = vrot.slane %v1974_v19, %v6267_v29  ;;  %v2236_v19 = vld [vmem:[#allocation3 + $0x8] sm:$0xff] }
 0x58e   : > { %v1989_v15 = vcombine.low %v1965_v13, %v1981_v43  ;;  %v1990_v20 = vcombine.high %v1965_v13, %v1981_v43  ;;  %v1991_v27 = vcombine.low %v1972_v24, %v1988_v25  ;;  %v1992_v33 = vcombine.high %v1972_v24, %v1988_v25  ;;  %v2235_v43 = vld [vmem:[#allocation3] sm:$0xff]  ;;  %v2237_v24 = vld [vmem:[#allocation3 + $0x10] sm:$0xff] }
 0x590   : > { %v1993_v16 = vpack.c.bf16 %v1989_v15, %v1989_v15  ;;  %v1994_v22 = vpack.c.bf16 %v1990_v20, %v1990_v20  ;;  %v1995_v31 = vpack.c.bf16 %v1991_v27, %v1991_v27  ;;  %v1996_v36 = vpack.c.bf16 %v1992_v33, %v1992_v33 }
 0x592   : > { %4088 = vmatmul.mubr.msk.bf16.vlgmr.msra.gmra.mrb[0].mxu1 %vm2001_vm2, %v1993_v16 }
 0x593   : > { %4092 = vmatpush3.bf16.xpose.msra.mxu1 %v2052_v17  ;;  %4093 = vmatprep.mubr.msk.bf16.mxu1 %vm5359_vm1, %v5358_v50 }
 0x594   : > { %4097 = vmatprep.subr.bf16.mxu1 %v5358_v50 }
 0x59a   : > { %4094 = vmatmul.mubr.msk.bf16.vlgmr.msra.gmra.mrb[4].mxu1 %vm2001_vm2, %v1994_v22 }
 0x59b   : > { %4098 = vmatpush3.bf16.xpose.msra.mxu1 %v2098_v23  ;;  %4099 = vmatprep.mubr.msk.bf16.mxu1 %vm5359_vm1, %v5358_v50 }
 0x59c   : > { %4103 = vmatprep.subr.bf16.mxu1 %v5358_v50 }
 0x5a2   : > { %4100 = vmatmul.mubr.msk.bf16.vlgmr.msra.gmra.mrb[8].mxu1 %vm2001_vm2, %v1995_v31 }
 0x5a3   : > { %4104 = vmatpush3.bf16.xpose.msra.mxu1 %v2144_v32  ;;  %4105 = vmatprep.mubr.msk.bf16.mxu1 %vm5359_vm1, %v5358_v50  ;;  %v2238_v32 = vld [vmem:[#allocation3 + $0x18] sm:$0xff] }
 0x5a4   : > { %4109 = vmatprep.subr.bf16.mxu1 %v5358_v50 }
 0x5aa   : > { %4106 = vmatmul.mubr.msk.bf16.vlgmr.msra.gmra.mrb[12].mxu1 %vm2001_vm2, %v1996_v36 }
 0x5ab   : > { %4111 = vmatprep.mubr.msk.bf16.mxu1 %vm5359_vm1, %v5358_v50  ;;  %4110 = vmatpush3.bf16.msra.mxu1 %v2235_v43  ;;  %v4563_v43 = vld [vmem:[#allocation13 + $0x38] sm:$0xff]  }
 0x5ac   : > { %4115 = vmatprep.subr.bf16.mxu1 %v5358_v50 }
 0x665   : > { %v2042_v37 = vpop.f32.mrb[0].mxu1 }
 0x666   : > { %v4089_v38 = vpop.f32.mrb[1].mxu1  ;;  %v2187_v39 = vsel %vm2186_vm3, %v2042_v37, -inf }
 0x667   : > { %2188 = vmax.xlane.f32.xlu1 %v2187_v39  ;;  %v2045_v34 = vpop.f32.mrb[2].mxu1  ;;  %v4556_v38 = vld [vmem:[#allocation13] sm:$0xff]   ;;  %v4557_v39 = vld [vmem:[#allocation13 + $0x8] sm:$0xff]  }
 0x668   : > { %v4090_v35 = vpop.f32.mrb[3].mxu1  ;;  %4134 = vmatpush3.bf16.msra.mxu0 %v4556_v38  ;;  %v4558_v34 = vld [vmem:[#allocation13 + $0x10] sm:$0xff]  }
 0x669   : > { %4135 = vmatprep.subr.bf16.mxu0 %v5358_v50  ;;  %v4559_v35 = vld [vmem:[#allocation13 + $0x18] sm:$0xff]  }
 0x66c   : > { %4136 = vmatpush3.bf16.msra.mxu0 %v4557_v39 }
 0x66d   : > { %v2088_v40 = vpop.f32.mrb[4].mxu1  ;;  %4137 = vmatprep.subr.bf16.mxu0 %v5358_v50 }
 0x66e   : > { %v4095_v41 = vpop.f32.mrb[5].mxu1  ;;  %v2190_v42 = vsel %vm2186_vm3, %v2088_v40, -inf }
 0x66f   : > { %2191 = vmax.xlane.f32.xlu0 %v2190_v42  ;;  %v2091_v44 = vpop.f32.mrb[6].mxu1  ;;  %v4561_v41 = vld [vmem:[#allocation13 + $0x28] sm:$0xff]  }
 0x670   : > { %v4096_v46 = vpop.f32.mrb[7].mxu1  ;;  %4138 = vmatpush3.bf16.msra.mxu0 %v4558_v34  ;;  %v4566_v34 = vld [vmem:[#allocation16 + $0x10] sm:$0xff]  }
 0x671   : > { %4139 = vmatprep.subr.bf16.mxu0 %v5358_v50 }
 0x674   : > { %4140 = vmatpush3.bf16.msra.mxu0 %v4559_v35  ;;  %v4568_v35 = vld [vmem:[#allocation16 + $0x20] sm:$0xff]  }
 0x675   : > { %v2134_v47 = vpop.f32.mrb[8].mxu1  ;;  %4141 = vmatprep.subr.bf16.mxu0 %v5358_v50 }
 0x676   : > { %v4101_v48 = vpop.f32.mrb[9].mxu1  ;;  %v2193_v51 = vsel %vm2186_vm3, %v2134_v47, -inf }
 0x677   : > { %2194 = vmax.xlane.f32.xlu0 %v2193_v51  ;;  %v2137_v52 = vpop.f32.mrb[10].mxu1 }
 0x678   : > { %v4102_v53 = vpop.f32.mrb[11].mxu1 }
 0x67d   : > { %v2180_v54 = vpop.f32.mrb[12].mxu1 }
 0x67e   : > { %v4107_v55 = vpop.f32.mrb[13].mxu1  ;;  %v2196_v57 = vsel %vm2186_vm3, %v2180_v54, -inf }
 0x67f   : > { %2197 = vmax.xlane.f32.xlu1 %v2196_v57  ;;  %v2183_v30 = vpop.f32.mrb[14].mxu1 }
 0x680   : > { %v4108_v58 = vpop.f32.mrb[15].mxu1 }
 0x6f4   : > { %v2189_v59 = vpop.xlane.xlu1 %2188 }
 0x6f5   : > { %v2199_v60 = vsub.f32 %v2042_v37, %v2189_v59 }
 0x6f7   : > { %v2203_v61 = vmul.f32 1.442695, %v2199_v60 }
 0x6f9   : > { %4636 = vpow2.f32 %v2203_v61 }
 0x6fc   : > { %v2192_v62 = vpop.xlane.xlu0 %2191 }
 0x6fd   : > { %v2200_v63 = vsub.f32 %v2088_v40, %v2192_v62  ;;  %v4560_v40 = vld [vmem:[#allocation13 + $0x20] sm:$0xff]  }
 0x6fe   : > { %4142 = vmatpush3.bf16.msra.mxu0 %v4560_v40  ;;  %v4569_v40 = vld [vmem:[#allocation16 + $0x28] sm:$0xff]  }
 0x6ff   : > { %v2205_v0 = vmul.f32 1.442695, %v2200_v63  ;;  %4143 = vmatprep.subr.bf16.mxu0 %v5358_v50 }
 0x701   : > { %4638 = vpow2.f32 %v2205_v0 }
 0x702   : > { %4144 = vmatpush3.bf16.msra.mxu0 %v4561_v41  ;;  %v4570_v41 = vld [vmem:[#allocation16 + $0x30] sm:$0xff]  }
 0x703   : > { %v4637_v1 = vpop.eup %4636  ;;  %4145 = vmatprep.subr.bf16.mxu0 %v5358_v50 }
 0x704   : > { %v2195_v2 = vpop.xlane.xlu0 %2194  ;;  %v2211_v3 = vsel %vm2186_vm3, %v4637_v1, 0.0 }
 0x705   : > { %v2201_v4 = vsub.f32 %v2134_v47, %v2195_v2  ;;  %2212 = vadd.xlane.f32.xlu0 %v2211_v3 }
 0x707   : > { %v2207_v5 = vmul.f32 1.442695, %v2201_v4 }
 0x709   : > { %4640 = vpow2.f32 %v2207_v5 }
 0x70b   : > { %v4639_v6 = vpop.eup %4638 }
 0x70c   : > { %v2198_v56 = vpop.xlane.xlu1 %2197  ;;  %v2214_v7 = vsel %vm2186_vm3, %v4639_v6, 0.0 }
 0x70d   : > { %v2202_v8 = vsub.f32 %v2180_v54, %v2198_v56  ;;  %2215 = vadd.xlane.f32.xlu1 %v2214_v7 }
 0x70f   : > { %v2209_v9 = vmul.f32 1.442695, %v2202_v8 }
 0x711   : > { %4642 = vpow2.f32 %v2209_v9 }
 0x713   : > { %v4641_v10 = vpop.eup %4640 }
 0x714   : > { %v2217_v11 = vsel %vm2186_vm3, %v4641_v10, 0.0 }
 0x715   : > { %2218 = vadd.xlane.f32.xlu0 %v2217_v11 }
 0x71b   : > { %v4643_v12 = vpop.eup %4642 }
 0x71c   : > { %v2220_v13 = vsel %vm2186_vm3, %v4643_v12, 0.0 }
 0x71d   : > { %2221 = vadd.xlane.f32.xlu1 %v2220_v13 }
 0x792   : > { %v2213_v14 = vpop.xlane.xlu0 %2212 }
 0x793   : > { %4644 = vrcp.f32 %v2213_v14 }
 0x79a   : > { %v2216_v15 = vpop.xlane.xlu1 %2215 }
 0x79b   : > { %4646 = vrcp.f32 %v2216_v15 }
 0x79d   : > { %v4645_v16 = vpop.eup %4644 }
 0x79e   : > { %v2227_v17 = vmul.f32 %v4645_v16, %v4637_v1 }
 0x7a0   : > { %v2231_v18 = vpack.c.bf16 %v2227_v17, %v2227_v17 }
 0x7a2   : > { %4112 = vmatmul.mubr.msk.bf16.vlgmr.msra.gmra.mrb[16].mxu1 %vm2186_vm3, %v2231_v18  ;;  %v2219_v20 = vpop.xlane.xlu0 %2218 }
 0x7a3   : > { %4116 = vmatpush3.bf16.msra.mxu1 %v2236_v19  ;;  %4648 = vrcp.f32 %v2219_v20  ;;  %4117 = vmatprep.mubr.msk.bf16.mxu1 %vm5359_vm1, %v5358_v50 }
 0x7a4   : > { %4121 = vmatprep.subr.bf16.mxu1 %v5358_v50 }
 0x7a5   : > { %v4647_v21 = vpop.eup %4646 }
 0x7a6   : > { %v2228_v22 = vmul.f32 %v4647_v21, %v4639_v6  ;;  %v4562_v6 = vld [vmem:[#allocation13 + $0x30] sm:$0xff]  }
 0x7a7   : > { %4146 = vmatpush3.bf16.msra.mxu0 %v4562_v6 }
 0x7a8   : > { %v2232_v23 = vpack.c.bf16 %v2228_v22, %v2228_v22  ;;  %4147 = vmatprep.subr.bf16.mxu0 %v5358_v50 }
 0x7aa   : > { %4118 = vmatmul.mubr.msk.bf16.vlgmr.msra.gmra.mrb[20].mxu1 %vm2186_vm3, %v2232_v23  ;;  %v2222_v25 = vpop.xlane.xlu1 %2221 }
 0x7ab   : > { %4122 = vmatpush3.bf16.msra.mxu1 %v2237_v24  ;;  %4650 = vrcp.f32 %v2222_v25  ;;  %4123 = vmatprep.mubr.msk.bf16.mxu1 %vm5359_vm1, %v5358_v50 }
 0x7ac   : > { %4127 = vmatprep.subr.bf16.mxu1 %v5358_v50  ;;  %4148 = vmatpush3.bf16.msra.mxu0 %v4563_v43 }
 0x7ad   : > { %v4649_v27 = vpop.eup %4648  ;;  %4173 = vmatprep.subr.bf16.mxu0 %v5358_v50 }
 0x7ae   : > { %v2229_v28 = vmul.f32 %v4649_v27, %v4641_v10  ;;  %v4564_v27 = vld [vmem:[#allocation16] sm:$0xff]  }
 0x7b0   : > { %v2233_v31 = vpack.c.bf16 %v2229_v28, %v2229_v28 }
 0x7b2   : > { %4124 = vmatmul.mubr.msk.bf16.vlgmr.msra.gmra.mrb[24].mxu1 %vm2186_vm3, %v2233_v31 }
 0x7b3   : > { %4128 = vmatpush3.bf16.msra.mxu1 %v2238_v32  ;;  %4129 = vmatprep.mubr.msk.bf16.mxu1 %vm5359_vm1, %v5358_v50 }
 0x7b4   : > { %4153 = vmatprep.subr.bf16.mxu1 %v5358_v50 }
 0x7b5   : > { %v4651_v33 = vpop.eup %4650 }
 0x7b6   : > { %v2230_v36 = vmul.f32 %v4651_v33, %v4643_v12 }
 0x7b8   : > { %v2234_v37 = vpack.c.bf16 %v2230_v36, %v2230_v36  ;;  %v4565_v36 = vld [vmem:[#allocation16 + $0x8] sm:$0xff]  }
 0x7ba   : > { %4130 = vmatmul.mubr.msk.bf16.vlgmr.msra.gmra.mrb[28].mxu1 %vm2186_vm3, %v2234_v37 }
 0x7bb   : > { %4169 = vmatprep.mubr.msk.bf16.mxu1 %vm5359_vm1, %v5358_v50  ;;  %4154 = vmatpush3.bf16.msra.mxu1 %v4564_v27  ;;  %v4583_v27 = vld [vmem:[#allocation25 + $0x10] ss:$8 sps:$4 sm:$0xff]  }
 0x7bc   : > { %4155 = vmatprep.subr.bf16.mxu1 %v5358_v50 }
 0x7bf   : > { %4156 = vmatpush3.bf16.msra.mxu1 %v4565_v36 }
 0x7c0   : > { %4157 = vmatprep.subr.bf16.mxu1 %v5358_v50 }
 0x7c3   : > { %4158 = vmatpush3.bf16.msra.mxu1 %v4566_v34  ;;  %v4597_v34 = vld [vmem:[#allocation25 + $0x54] ss:$8 sps:$4 sm:$0xff]  }
 0x7c4   : > { %4159 = vmatprep.subr.bf16.mxu1 %v5358_v50 }
 0x875   : > { %v2276_v42 = vpop.f32.mrb[16].mxu1 }
 0x876   : > { %v4113_v44 = vpop.f32.mrb[17].mxu1 }
 0x877   : > { %v2279_v46 = vpop.f32.mrb[18].mxu1 }
 0x878   : > { %v4114_v47 = vpop.f32.mrb[19].mxu1 }
 0x87d   : > { %v2319_v48 = vpop.f32.mrb[20].mxu1 }
 0x87e   : > { %v4119_v51 = vpop.f32.mrb[21].mxu1 }
 0x87f   : > { %v2322_v52 = vpop.f32.mrb[22].mxu1 }
 0x880   : > { %v4120_v53 = vpop.f32.mrb[23].mxu1 }
 0x881   : > { %v4571_v53 = vld [vmem:[#allocation16 + $0x38] sm:$0xff]  }
 0x885   : > { %v2362_v54 = vpop.f32.mrb[24].mxu1 }
 0x886   : > { %v2411_v55 = vcombine.low %v2276_v42, %v2362_v54  ;;  %v2412_v57 = vcombine.high %v2276_v42, %v2362_v54  ;;  %v4125_v30 = vpop.f32.mrb[25].mxu1  ;;  %v4572_v54 = vld [vmem:[#allocation19] sm:$0xff]  }
 0x887   : > { %v2365_v58 = vpop.f32.mrb[26].mxu1  ;;  %v3885_v30 = vld [vmem:[#allocation15] ss:$0 sm:$0xff] }
 0x888   : > { %v4126_v59 = vpop.f32.mrb[27].mxu1  ;;  %v2419_v1 = vrot.slane %v2411_v55, %v6264_v49  ;;  %v2426_v2 = vrot.slane %v2412_v57, %v6264_v49  ;;  %v4573_v55 = vld [vmem:[#allocation19 + $0x8] sm:$0xff]   ;;  %v4574_v57 = vld [vmem:[#allocation19 + $0x10] sm:$0xff]  }
 0x88d   : > { %v2405_v60 = vpop.f32.mrb[28].mxu1 }
 0x88e   : > { %v2427_v61 = vcombine.low %v2319_v48, %v2405_v60  ;;  %v2428_v62 = vcombine.high %v2319_v48, %v2405_v60  ;;  %v4131_v63 = vpop.f32.mrb[29].mxu1 }
 0x88f   : > { %v2408_v0 = vpop.f32.mrb[30].mxu1 }
 0x890   : > { %v2435_v3 = vrot.slane %v2427_v61, %v6264_v49  ;;  %v2442_v4 = vrot.slane %v2428_v62, %v6264_v49  ;;  %v4132_v5 = vpop.f32.mrb[31].mxu1  ;;  %v4575_v0 = vld [vmem:[#allocation19 + $0x18] sm:$0xff]  }
 0x891   : > { %v3894_v5 = vld [vmem:[#allocation18] ss:$0 sm:$0xff] }
 0x892   : > { %v2443_v56 = vcombine.low %v2419_v1, %v2435_v3  ;;  %v2444_v7 = vcombine.high %v2419_v1, %v2435_v3  ;;  %v2459_v8 = vcombine.low %v2426_v2, %v2442_v4  ;;  %v2460_v9 = vcombine.high %v2426_v2, %v2442_v4  ;;  %v4576_v1 = vld [vmem:[#allocation19 + $0x20] sm:$0xff]   ;;  %v4577_v2 = vld [vmem:[#allocation19 + $0x28] sm:$0xff]   ;;  %v4578_v3 = vld [vmem:[#allocation19 + $0x30] sm:$0xff]  }
 0x893   : > { %v4579_v4 = vld [vmem:[#allocation19 + $0x38] sm:$0xff]  }
 0x894   : > { %v2451_v10 = vrot.slane %v2443_v56, %v6267_v29  ;;  %v2458_v11 = vrot.slane %v2444_v7, %v6267_v29  ;;  %v2467_v12 = vrot.slane %v2459_v8, %v6267_v29  ;;  %v2474_v13 = vrot.slane %v2460_v9, %v6267_v29 }
 0x896   : > { %v2479_v14 = vcombine.low %v2451_v10, %v2458_v11  ;;  %v3883_v15 = vcombine.high %v2451_v10, %v2458_v11  ;;  %v2495_v16 = vcombine.low %v2467_v12, %v2474_v13  ;;  %v3884_v17 = vcombine.high %v2467_v12, %v2474_v13 }
 0x898   : > { %v2486_v18 = vrot.slane %v2479_v14, %v6264_v49  ;;  %v2494_v19 = vrot.slane %v3883_v15, %v6264_v49  ;;  %v2502_v20 = vrot.slane %v2495_v16, %v6264_v49  ;;  %v2510_v21 = vrot.slane %v3884_v17, %v6264_v49  ;;  %v3903_v15 = vld [vmem:[#allocation21] ss:$0 sm:$0xff] }
 0x89a   : > { %v2512_v22 = vcombine.high %v2486_v18, %v2494_v19  ;;  %v2528_v23 = vcombine.high %v2502_v20, %v2510_v21  ;;  %v2511_v24 = vcombine.low %v2486_v18, %v2494_v19  ;;  %v2527_v25 = vcombine.low %v2502_v20, %v2510_v21 }
 0x89c   : > { %v2526_v28 = vrot.slane %v2512_v22, %v6267_v29  ;;  %v2542_v31 = vrot.slane %v2528_v23, %v6267_v29  ;;  %v2519_v32 = vrot.slane %v2511_v24, %v6267_v29  ;;  %v2535_v33 = vrot.slane %v2527_v25, %v6267_v29  ;;  %v4567_v29 = vld [vmem:[#allocation16 + $0x18] sm:$0xff]   ;;  %v4580_v23 = vld [vmem:[#allocation25] ss:$8 sps:$4 sm:$0xff]   ;;  %v4582_v24 = vld [vmem:[#allocation25 + $0x4] ss:$8 sps:$4 sm:$0xff]  }
 0x89d   : > { %4160 = vmatpush3.bf16.msra.mxu1 %v4567_v29  ;;  %v4585_v25 = vld [vmem:[#allocation25 + $0x14] ss:$8 sps:$4 sm:$0xff]   ;;  %v4595_v29 = vld [vmem:[#allocation25 + $0x50] ss:$8 sps:$4 sm:$0xff]  }
 0x89e   : > { %v2545_v49 = vcombine.low %v2526_v28, %v2542_v31  ;;  %v2544_v37 = vcombine.high %v2519_v32, %v2535_v33  ;;  %v2546_v38 = vcombine.high %v2526_v28, %v2542_v31  ;;  %v2543_v39 = vcombine.low %v2519_v32, %v2535_v33  ;;  %4161 = vmatprep.subr.bf16.mxu1 %v5358_v50  ;;  %v4588_v28 = vld [vmem:[#allocation25 + $0x24] ss:$8 sps:$4 sm:$0xff]   ;;  %v4586_v31 = vld [vmem:[#allocation25 + $0x20] ss:$8 sps:$4 sm:$0xff]  }
 0x8a0   : > { %2552 = vrot.lane.b32.xlu1 %v2545_v49, %s5362_s26  ;;  %2548 = vrot.lane.b32.xlu0 %v2544_v37, %s5360_s10  ;;  %v4591_v37 = vld [vmem:[#allocation25 + $0x34] ss:$8 sps:$4 sm:$0xff]   ;;  %s6656_s10 = sld [smem:[#allocation73_spill]]  ;;  %s6661_s26 = sld [smem:[#allocation76_spill]] }
 0x8a1   : > { %4162 = vmatpush3.bf16.msra.mxu1 %v4568_v35  ;;  %v4600_v35 = vld [vmem:[#allocation25 + $0x64] ss:$8 sps:$4 sm:$0xff]  }
 0x8a2   : > { %4163 = vmatprep.subr.bf16.mxu1 %v5358_v50 }
 0x8a4   : > { %2556 = vrot.lane.b32.xlu1 %v2546_v38, %s5361_s18  ;;  %v4594_v38 = vld [vmem:[#allocation25 + $0x44] ss:$8 sps:$4 sm:$0xff]  }
 0x8a5   : > { %4164 = vmatpush3.bf16.msra.mxu1 %v4569_v40  ;;  %v4598_v40 = vld [vmem:[#allocation25 + $0x60] ss:$8 sps:$4 sm:$0xff]  }
 0x8a6   : > { %4165 = vmatprep.subr.bf16.mxu1 %v5358_v50 }
 0x8a9   : > { %4166 = vmatpush3.bf16.msra.mxu1 %v4570_v41  ;;  %v4603_v41 = vld [vmem:[#allocation25 + $0x74] ss:$8 sps:$4 sm:$0xff]  }
 0x8aa   : > { %4167 = vmatprep.subr.bf16.mxu1 %v5358_v50 }
 0x8ad   : > { %4168 = vmatpush3.bf16.msra.mxu1 %v4571_v53 }
 0x8ae   : > { %3044 = vmatprep.subr.bf16.mxu1 %v4582_v24 }
 0x912   : > { %v2553_v42 = vpop.permute.xlu1 %2552  ;;  %v2549_v44 = vpop.permute.xlu0 %2548 }
 0x913   : > { %v2559_v46 = vsel %vm2001_vm2, %v2543_v39, %v2549_v44  ;;  %v4592_v39 = vld [vmem:[#allocation25 + $0x40] ss:$8 sps:$4 sm:$0xff]   ;;  %v5365_v44 = vmov 0  }
 0x914   : > { %v2561_v48 = vsel %vm2560_vm4, %v2559_v46, %v2553_v42  ;;  %v4601_v42 = vld [vmem:[#allocation25 + $0x70] ss:$8 sps:$4 sm:$0xff]   ;;  %v4604_v46 = vld [vmem:[#allocation28 + $0x40] sm:$0xff]  }
 0x916   : > { %v2557_v47 = vpop.permute.xlu1 %2556 }
 0x917   : > { %v2563_v51 = vsel %vm2562_vm5, %v2561_v48, %v2557_v47  ;;  %v4605_v47 = vld [vmem:[#allocation28] sm:$0xff]   ;;  %v4606_v48 = vld [vmem:[#allocation28 + $0x48] sm:$0xff]  }
 0x918   : > { %v2581_v52 = vpack.c.bf16 %v2563_v51, %v2563_v51  ;;  %v4607_v51 = vld [vmem:[#allocation28 + $0x8] sm:$0xff]  }
 0x91a   : > { %4150 = vmatmul.mubr.bf16.vlgmr.msra.gmra.mrb[4].mxu0 %v2581_v52 }
 0x91b   : > { %4189 = vmatprep.mubr.msk.bf16.mxu0 %vm5359_vm1, %v5358_v50  ;;  %4174 = vmatpush3.bf16.msra.mxu0 %v4572_v54 }
 0x91c   : > { %4175 = vmatprep.subr.bf16.mxu0 %v5358_v50 }
 0x91f   : > { %4176 = vmatpush3.bf16.msra.mxu0 %v4573_v55 }
 0x920   : > { %4177 = vmatprep.subr.bf16.mxu0 %v5358_v50 }
 0x923   : > { %4178 = vmatpush3.bf16.msra.mxu0 %v4574_v57  ;;  %v3912_v57 = vld [vmem:[#allocation22] ss:$0 sm:$0xff] }
 0x924   : > { %4179 = vmatprep.subr.bf16.mxu0 %v5358_v50 }
 0x927   : > { %4180 = vmatpush3.bf16.msra.mxu0 %v4575_v0  ;;  %v4610_v0 = vld [vmem:[#allocation28 + $0x58] sm:$0xff]  }
 0x928   : > { %4181 = vmatprep.subr.bf16.mxu0 %v5358_v50 }
 0x92b   : > { %4182 = vmatpush3.bf16.msra.mxu0 %v4576_v1  ;;  %v4611_v1 = vld [vmem:[#allocation28 + $0x18] sm:$0xff]  }
 0x92c   : > { %4183 = vmatprep.subr.bf16.mxu0 %v5358_v50 }
 0x92f   : > { %4184 = vmatpush3.bf16.msra.mxu0 %v4577_v2  ;;  %v4612_v2 = vld [vmem:[#allocation28 + $0x60] sm:$0xff]  }
 0x930   : > { %4185 = vmatprep.subr.bf16.mxu0 %v5358_v50 }
 0x933   : > { %4186 = vmatpush3.bf16.msra.mxu0 %v4578_v3  ;;  %v4613_v3 = vld [vmem:[#allocation28 + $0x20] sm:$0xff]  }
 0x934   : > { %4187 = vmatprep.subr.bf16.mxu0 %v5358_v50 }
 0x937   : > { %4188 = vmatpush3.bf16.msra.mxu0 %v4579_v4  ;;  %v4614_v4 = vld [vmem:[#allocation28 + $0x68] sm:$0xff]  }
 0x938   : > { %4025 = vmatprep.subr.bf16.mxu0 %v4604_v46 }
 0x9ed   : > { %v2670_v58 = vpop.f32.mrb[4].mxu0 }
 0x9ee   : > { %v2671_v59 = vadd.f32 %v3885_v30, %v2670_v58  ;;  %v4151_v60 = vpop.f32.mrb[5].mxu0  ;;  %v3913_v58 = vld [vmem:[#allocation24] ss:$0 sm:$0xff] }
 0x9ef   : > { %v2673_v61 = vpop.f32.mrb[6].mxu0 }
 0x9f0   : > { %v2693_v62 = vpack.c.bf16 %v2671_v59, %v2671_v59  ;;  %v4152_v63 = vpop.f32.mrb[7].mxu0 }
 0x9f1   : > { %v4609_v63 = vld [vmem:[#allocation28 + $0x10] sm:$0xff]  }
 0x9f2   : > { %4170 = vmatmul.mubr.bf16.vlgmr.msra.gmra.mrb[32].mxu1 %v2693_v62  ;;  %v4608_v62 = vld [vmem:[#allocation28 + $0x50] sm:$0xff]  }
 0x9f3   : > { %3045 = vmatpush1.bf16.msra.mxu1 %v4580_v23  ;;  %3076 = vmatprep.mubr.bf16.mxu1 %v5365_v44 }
 0x9f4   : > { %3046 = vmatprep.subr.bf16.mxu1 %v4585_v25 }
 0x9f7   : > { %3047 = vmatpush1.bf16.msra.mxu1 %v4583_v27 }
 0x9f8   : > { %3048 = vmatprep.subr.bf16.mxu1 %v4588_v28 }
 0x9fb   : > { %3049 = vmatpush1.bf16.msra.mxu1 %v4586_v31 }
 0x9fc   : > { %3050 = vmatprep.subr.bf16.mxu1 %v4591_v37 }
 0xac5   : > { %v2782_v6 = vpop.f32.mrb[32].mxu1 }
 0xac6   : > { %v2783_v56 = vadd.f32 %v3894_v5, %v2782_v6  ;;  %v4171_v7 = vpop.f32.mrb[33].mxu1  ;;  %v4615_v5 = vld [vmem:[#allocation28 + $0x28] sm:$0xff]   ;;  %v4616_v6 = vld [vmem:[#allocation28 + $0x70] sm:$0xff]  }
 0xac7   : > { %v2785_v8 = vpop.f32.mrb[34].mxu1  ;;  %v4618_v7 = vld [vmem:[#allocation28 + $0x78] sm:$0xff]  }
 0xac8   : > { %v2789_v9 = vmul.f32 0.70710677, %v2783_v56  ;;  %v4172_v10 = vpop.f32.mrb[35].mxu1  ;;  %v2788_v12 = vmul.f32 0.5, %v2783_v56  ;;  %v4617_v56 = vld [vmem:[#allocation28 + $0x30] sm:$0xff]   ;;  %v4619_v8 = vld [vmem:[#allocation28 + $0x38] sm:$0xff]  }
 0xac9   : > { %v4621_v10 = vld [vmem:[%s6655_s13 + $0x8] sm:$0xff]  }
 0xaca   : > { %4652 = verf.f32 %v2789_v9  ;;  %v4620_v9 = vld [vmem:[%s6654_s2] sm:$0xff]   ;;  %s6659_s2 = sld [smem:[#allocation46_spill]] }
 0xad0   : > { %s6663_s12 = sand.u32 1, %s6659_s2  }
 0xad1   : > { %s3532_s5 = scalar_lea.sflag [#allocation6], %s6663_s12 }
 0xad4   : > { %v4653_v11 = vpop.eup %4652 }
 0xad5   : > { %v2791_v13 = vadd.f32 1.0, %v4653_v11  ;;  %v4622_v11 = vld [vmem:[%s6655_s13 + $0x10] sm:$0xff]  }
 0xad7   : > { %v2792_v43 = vmul.f32 %v2791_v13, %v2788_v12  ;;  %v4623_v12 = vld [vmem:[%s6655_s13 + $0x18] sm:$0xff]   ;;  %v4624_v13 = vld [vmem:[%s6655_s13 + $0x20] sm:$0xff]  }
 0xad9   : > { %v2810_v14 = vpack.c.bf16 %v2792_v43, %v2792_v43  ;;  %v4625_v43 = vld [vmem:[%s6655_s13 + $0x28] sm:$0xff]  }
 0xadb   : > { %4190 = vmatmul.mubr.bf16.vlgmr.msra.gmra.mrb[8].mxu0 %v2810_v14  ;;  %v2956_v14 = vsub.s32 0, %v6261_v45 }
 0xadc   : > { %4026 = vmatpush3.bf16.msra.mxu0 %v4605_v47 }
 0xadd   : > { %4027 = vmatprep.subr.bf16.mxu0 %v4606_v48 }
 0xae0   : > { %4028 = vmatpush3.bf16.msra.mxu0 %v4607_v51 }
 0xae1   : > { %4029 = vmatprep.subr.bf16.mxu0 %v4608_v62 }
 0xae4   : > { %4030 = vmatpush3.bf16.msra.mxu0 %v4609_v63 }
 0xae5   : > { %4031 = vmatprep.subr.bf16.mxu0 %v4610_v0 }
 0xae8   : > { %4032 = vmatpush3.bf16.msra.mxu0 %v4611_v1 }
 0xae9   : > { %4033 = vmatprep.subr.bf16.mxu0 %v4612_v2 }
 0xaec   : > { %4034 = vmatpush3.bf16.msra.mxu0 %v4613_v3 }
 0xaed   : > { %4035 = vmatprep.subr.bf16.mxu0 %v4614_v4 }
 0xaf0   : > { %4036 = vmatpush3.bf16.msra.mxu0 %v4615_v5 }
 0xaf1   : > { %4037 = vmatprep.subr.bf16.mxu0 %v4616_v6 }
 0xaf4   : > { %4038 = vmatpush3.bf16.msra.mxu0 %v4617_v56 }
 0xaf5   : > { %4039 = vmatprep.subr.bf16.mxu0 %v4618_v7 }
 0xaf8   : > { %4040 = vmatpush3.bf16.msra.mxu0 %v4619_v8 }
 0xaf9   : > { %4213 = vmatprep.subr.bf16.mxu0 %v5358_v50 }
 0xbae   : > { %v2899_v16 = vpop.f32.mrb[8].mxu0 }
 0xbaf   : > { %v2900_v17 = vadd.f32 %v3903_v15, %v2899_v16  ;;  %v4191_v18 = vpop.f32.mrb[9].mxu0  ;;  %v2951_v15 = vld [vmem:[#allocation27] sm:$0x3]  ;;  %v2960_v16 = vsub.s32 1, %v6261_v45 }
 0xbb0   : > { %v2902_v19 = vpop.f32.mrb[10].mxu0 }
 0xbb1   : > { %v2905_v20 = vadd.f32 %v2900_v17, %v2671_v59  ;;  %v4192_v21 = vpop.f32.mrb[11].mxu0  ;;  %v2957_v17 = vrot.slane %v2951_v15, %v2956_v14  ;;  %v2961_v18 = vrot.slane %v2951_v15, %v2960_v16 }
 0xbb3   : > { %v2906_v22 = vadd.f32 %v2905_v20, %v6248_v26  ;;  %v4589_v26 = vld [vmem:[#allocation25 + $0x30] ss:$8 sps:$4 sm:$0xff]  }
 0xbb4   : > { %3051 = vmatpush1.bf16.msra.mxu1 %v4589_v26 }
 0xbb5   : > { %2909 = vadd.xlane.f32.xlu0 %v2906_v22  ;;  %3052 = vmatprep.subr.bf16.mxu1 %v4594_v38 }
 0xbb8   : > { %3053 = vmatpush1.bf16.msra.mxu1 %v4592_v39  ;;  %v4626_v39 = vld [vmem:[%s6655_s13 + $0x30] sm:$0xff]  }
 0xbb9   : > { %3054 = vmatprep.subr.bf16.mxu1 %v4597_v34  ;;  %v4627_v34 = vld [vmem:[%s6655_s13 + $0x38] sm:$0xff]  }
 0xbbc   : > { %3055 = vmatpush1.bf16.msra.mxu1 %v4595_v29  ;;  %v4628_v29 = vld [vmem:[#allocation31] sm:$0xff]  }
 0xbbd   : > { %3056 = vmatprep.subr.bf16.mxu1 %v4600_v35  ;;  %v4629_v35 = vld [vmem:[#allocation31 + $0x8] sm:$0xff]  }
 0xbc0   : > { %3057 = vmatpush1.bf16.msra.mxu1 %v4598_v40  ;;  %v4630_v40 = vld [vmem:[#allocation31 + $0x10] sm:$0xff]  }
 0xbc1   : > { %3058 = vmatprep.subr.bf16.mxu1 %v4603_v41 }
 0xbc4   : > { %3059 = vmatpush1.bf16.msra.mxu1 %v4601_v42  ;;  %v3930_v42 = vld [vmem:[#allocation30] ss:$0 sm:$0xff] }
 0xbc5   : > { %4193 = vmatprep.subr.bf16.mxu1 %v5358_v50 }
 0xc42   : > { %v2910_v32 = vpop.xlane.xlu0 %2909 }
 0xc43   : > { %v2912_v33 = vmul.f32 0.0078125, %v2910_v32 }
 0xc45   : > { %v2913_v36 = vsub.f32 %v2906_v22, %v2912_v33 }
 0xc47   : > { %v2914_v49 = vmul.f32 %v2913_v36, %v2913_v36 }
 0xc49   : > { %2915 = vadd.xlane.f32.xlu1 %v2914_v49 }
 0xcd6   : > { %v2916_v52 = vpop.xlane.xlu1 %2915 }
 0xcd7   : > { %v2917_v53 = vmul.f32 0.0078125, %v2916_v52 }
 0xcd9   : > { %v2918_v54 = vadd.f32 1e-05, %v2917_v53  ;;  %v4631_v53 = vld [vmem:[#allocation31 + $0x18] sm:$0xff]  }
 0xcdb   : > { %4654 = vrsqrt.f32 %v2918_v54  ;;  %v4632_v54 = vld [vmem:[#allocation31 + $0x20] sm:$0xff]  }
 0xce5   : > { %v4655_v55 = vpop.eup %4654 }
 0xce6   : > { %v2920_v30 = vmul.f32 %v4655_v55, %v2913_v36  ;;  %v4633_v55 = vld [vmem:[#allocation31 + $0x28] sm:$0xff]  }
 0xce8   : > { %v2927_v59 = vmul.f32 %v3912_v57, %v2920_v30  ;;  %v4634_v57 = vld [vmem:[#allocation31 + $0x30] sm:$0xff]   ;;  %v4635_v30 = vld [vmem:[#allocation31 + $0x38] sm:$0xff]  }
 0xcea   : > { %v6373_v60 = vadd.f32 %v3913_v58, %v2927_v59  ;;  %v3947_v58 = vld [vmem:[%s6656_s10] ss:$0 sm:$0xff] }
 0xcec   : > { %v2952_v61 = vpack.c.bf16 %v6373_v60, %v6373_v60 }
 0xcee   : > { %3077 = vmatmul.mubr.bf16.vlgmr.msra.gmra.mrb[36].mxu1 %v2952_v61 }
 0xcef   : > { %4209 = vmatprep.mubr.msk.bf16.mxu1 %vm5359_vm1, %v5358_v50  ;;  %4194 = vmatpush3.bf16.msra.mxu1 %v4620_v9 }
 0xcf0   : > { %4195 = vmatprep.subr.bf16.mxu1 %v5358_v50 }
 0xcf3   : > { %4196 = vmatpush3.bf16.msra.mxu1 %v4621_v10 }
 0xcf4   : > { %4197 = vmatprep.subr.bf16.mxu1 %v5358_v50 }
 0xcf7   : > { %4198 = vmatpush3.bf16.msra.mxu1 %v4622_v11 }
 0xcf8   : > { %4199 = vmatprep.subr.bf16.mxu1 %v5358_v50 }
 0xcfb   : > { %4200 = vmatpush3.bf16.msra.mxu1 %v4623_v12 }
 0xcfc   : > { %4201 = vmatprep.subr.bf16.mxu1 %v5358_v50 }
 0xcff   : > { %4202 = vmatpush3.bf16.msra.mxu1 %v4624_v13 }
 0xd00   : > { %4203 = vmatprep.subr.bf16.mxu1 %v5358_v50 }
 0xd03   : > { %4204 = vmatpush3.bf16.msra.mxu1 %v4625_v43 }
 0xd04   : > { %4205 = vmatprep.subr.bf16.mxu1 %v5358_v50 }
 0xd07   : > { %4206 = vmatpush3.bf16.msra.mxu1 %v4626_v39 }
 0xd08   : > { %4207 = vmatprep.subr.bf16.mxu1 %v5358_v50 }
 0xd0b   : > { %4208 = vmatpush3.bf16.msra.mxu1 %v4627_v34 }
 0xdc1   : > { %v3078_v19 = vpop.f32.mrb[36].mxu1 }
 0xdc2   : > { %v3079_v20 = vadd.f32 %v3078_v19, %v2957_v17  ;;  %v3080_v21 = vpop.f32.mrb[37].mxu1 }
 0xdc3   : > { %v3081_v22 = vadd.f32 %v3080_v21, %v2961_v18  ;;  %v3082_v23 = vpop.f32.mrb[38].mxu1  ;;  %v3966_v21 = vld [vmem:[%s6661_s26] ss:$0 sm:$0xff] }
 0xdc4   : > { %v3087_v24 = vmul.f32 0.70710677, %v3079_v20  ;;  %v3083_v25 = vpop.f32.mrb[39].mxu1  ;;  %v3085_v32 = vmul.f32 0.5, %v3079_v20 }
 0xdc5   : > { %v3088_v27 = vmul.f32 0.70710677, %v3081_v22  ;;  %v3086_v36 = vmul.f32 0.5, %v3081_v22 }
 0xdc6   : > { %4656 = verf.f32 %v3087_v24 }
 0xdc7   : > { %4658 = verf.f32 %v3088_v27 }
 0xdd0   : > { %v4657_v28 = vpop.eup %4656 }
 0xdd1   : > { %v4659_v31 = vpop.eup %4658  ;;  %v3091_v33 = vadd.f32 1.0, %v4657_v28 }
 0xdd2   : > { %v3092_v49 = vadd.f32 1.0, %v4659_v31 }
 0xdd3   : > { %v3093_v37 = vmul.f32 %v3091_v33, %v3085_v32 }
 0xdd4   : > { %v3094_v45 = vmul.f32 %v3092_v49, %v3086_v36 }
 0xdd5   : > { %v3128_v38 = vpack.c.bf16 %v3093_v37, %v3093_v37 }
 0xdd6   : > { %v3129_v26 = vpack.c.bf16 %v3094_v45, %v3094_v45 }
 0xdd8   : > { %3264 = vmatprep.mubr.bf16.mxu0 %v3129_v26 }
 0xdd9   : > { %3265 = vmatmul.mubr.bf16.vlgmr.msra.gmra.mrb[12].mxu0 %v3128_v38 }
 0xdda   : > { %4229 = vmatprep.mubr.msk.bf16.mxu0 %vm5359_vm1, %v5358_v50  ;;  %4214 = vmatpush3.bf16.msra.mxu0 %v4628_v29 }
 0xddb   : > { %4215 = vmatprep.subr.bf16.mxu0 %v5358_v50 }
 0xdde   : > { %4216 = vmatpush3.bf16.msra.mxu0 %v4629_v35 }
 0xddf   : > { %4217 = vmatprep.subr.bf16.mxu0 %v5358_v50 }
 0xde2   : > { %4218 = vmatpush3.bf16.msra.mxu0 %v4630_v40 }
 0xde3   : > { %4219 = vmatprep.subr.bf16.mxu0 %v5358_v50 }
 0xde6   : > { %4220 = vmatpush3.bf16.msra.mxu0 %v4631_v53 }
 0xde7   : > { %4221 = vmatprep.subr.bf16.mxu0 %v5358_v50 }
 0xdea   : > { %4222 = vmatpush3.bf16.msra.mxu0 %v4632_v54 }
 0xdeb   : > { %4223 = vmatprep.subr.bf16.mxu0 %v5358_v50 }
 0xdee   : > { %4224 = vmatpush3.bf16.msra.mxu0 %v4633_v55 }
 0xdef   : > { %4225 = vmatprep.subr.bf16.mxu0 %v5358_v50 }
 0xdf2   : > { %4226 = vmatpush3.bf16.msra.mxu0 %v4634_v57 }
 0xdf3   : > { %4227 = vmatprep.subr.bf16.mxu0 %v5358_v50  ;;  %v3956_v50 = vld [vmem:[%s6657_s8] ss:$0 sm:$0xff]  ;;  %s3969_s8 = sshll.u32 %s3543_s30, 7  ;;  %s5366_s30 = smov [#allocation33]  }
 0xdf4   : > { %s6442_s16 = scalar_lea.hbm %s6662_s22, %s3969_s8  ;;  %s5174_s14 = sshll.u32 %s5366_s30, 4  ;;  %s5175_s14 = int_to_ptr.vmem [resolvable:$false] %s5174_s14 }
 0xdf5   : > { %s5176_s11 = scalar_lea.vmem %s5175_s14, 256  ;;  %p5177_p7 = scmp.lt.s32.totalorder %s6444_s21, %s5175_s14 }
 0xdf6   : > { %4228 = vmatpush3.bf16.msra.mxu0 %v4635_v30  ;;  %p5178_p1 = scmp.lt.s32.totalorder %s5176_s11, %s5170_s15 }
 0xdf8   : > { %p5179_p8 = por %p5178_p1, %p5177_p7 }
 0xdfa   : > { %p5180_p11 = pnand %p5179_p8, %p5173_p2 }
 0xeac   : > { %v4041_v41 = vpop.f32.mrb[12].mxu0 }
 0xead   : > { %v4042_v44 = vpop.f32.mrb[13].mxu0 }
 0xeae   : > { %v4043_v46 = vadd.f32 %v4042_v44, %v4041_v41  ;;  %v4044_v47 = vpop.f32.mrb[14].mxu0 }
 0xeaf   : > { %v4045_v48 = vpop.f32.mrb[15].mxu0 }
 0xeb0   : > { %v3267_v51 = vadd.f32 %v4043_v46, %v3930_v42 }
 0xeb2   : > { %v3289_v52 = vpack.c.bf16 %v3267_v51, %v3267_v51 }
 0xeb4   : > { %4210 = vmatmul.mubr.bf16.vlgmr.msra.gmra.mrb[40].mxu1 %v3289_v52 }
 0xf87   : > { %v3378_v59 = vpop.f32.mrb[40].mxu1 }
 0xf88   : > { %v3379_v61 = vadd.f32 %v3947_v58, %v3378_v59  ;;  %v4211_v62 = vpop.f32.mrb[41].mxu1 }
 0xf89   : > { %v3381_v63 = vpop.f32.mrb[42].mxu1 }
 0xf8a   : > { %v3385_v0 = vmul.f32 0.70710677, %v3379_v61  ;;  %v4212_v1 = vpop.f32.mrb[43].mxu1  ;;  %v3384_v3 = vmul.f32 0.5, %v3379_v61 }
 0xf8c   : > { %4660 = verf.f32 %v3385_v0 }
 0xf96   : > { %v4661_v2 = vpop.eup %4660 }
 0xf97   : > { %v3387_v4 = vadd.f32 1.0, %v4661_v2 }
 0xf99   : > { %v3388_v5 = vmul.f32 %v3387_v4, %v3384_v3 }
 0xf9b   : > { %v3406_v6 = vpack.c.bf16 %v3388_v5, %v3388_v5 }
 0xf9d   : > { %4230 = vmatmul.mubr.bf16.vlgmr.msra.gmra.mrb[16].mxu0 %v3406_v6 }
0x1070   : > { %v3495_v56 = vpop.f32.mrb[16].mxu0 }
0x1071   : > { %v3496_v7 = vadd.f32 %v3956_v50, %v3495_v56  ;;  %v4231_v8 = vpop.f32.mrb[17].mxu0 }
0x1072   : > { %v3498_v9 = vpop.f32.mrb[18].mxu0 }
0x1073   : > { %v3501_v10 = vadd.f32 %v3496_v7, %v3267_v51  ;;  %v4232_v11 = vpop.f32.mrb[19].mxu0 }
0x1075   : > { %v3502_v12 = vadd.f32 %v3501_v10, %v6373_v60  ;;  %v3965_v60 = vld [vmem:[%s6660_s20] ss:$0 sm:$0xff] }
0x1077   : > { %3505 = vadd.xlane.f32.xlu0 %v3502_v12 }
0x1104   : > { %v3506_v13 = vpop.xlane.xlu0 %3505 }
0x1105   : > { %v3507_v43 = vmul.f32 0.0078125, %v3506_v13 }
0x1107   : > { %v3508_v14 = vsub.f32 %v3502_v12, %v3507_v43 }
0x1109   : > { %v3509_v15 = vmul.f32 %v3508_v14, %v3508_v14 }
0x110b   : > { %3510 = vadd.xlane.f32.xlu0 %v3509_v15 }
0x1198   : > { %v3511_v16 = vpop.xlane.xlu0 %3510 }
0x1199   : > { %v3512_v17 = vmul.f32 0.0078125, %v3511_v16 }
0x119b   : > { %v3513_v18 = vadd.f32 1e-05, %v3512_v17 }
0x119d   : > { %4662 = vrsqrt.f32 %v3513_v18 }
0x11a7   : > { %v4663_v19 = vpop.eup %4662 }
0x11a8   : > { %v3515_v20 = vmul.f32 %v4663_v19, %v3508_v14 }
0x11aa   : > { %v3522_v22 = vmul.f32 %v3965_v60, %v3515_v20 }
0x11ac   : > { %v3529_v23 = vadd.f32 %v3966_v21, %v3522_v22 }
0x11ae   : > { %3530 = vst [vmem:[%s971_s0] sm:$0xff] %v3529_v23 }
0x11af   : > { %5183 = shalt.err (!%p5180_p11)
}
0x11b0   : > { %s5184_s3 = scalar_lea.hbm %s6442_s16, 128  ;;  %s5188_s2 = scalar_lea.hbm %s6662_s22, 512 }
0x11b1   : > { %p5185_p6 = scmp.ne.s32.totalorder %s6442_s16, %s5184_s3  ;;  %p5189_p9 = scmp.lt.u32.totalorder %s6442_s16, %s6662_s22 }
0x11b2   : > { %p5190_p4 = scmp.lt.u32.totalorder %s5188_s2, %s5184_s3  ;;  %p5192_p3 = scmp.lt.u32.totalorder %s5184_s3, %s6442_s16 }
0x11b3   : > { %p5186_p13 = pnand %p5185_p6, %p6664_p5 }
0x11b4   : > { %p5191_p10 = por %p5190_p4, %p5189_p9 }
0x11b5   : > { %p5187_p0 = pneg %p5186_p13 }
0x11b6   : > { %p5193_p12 = por %p5192_p3, %p5191_p10 }
0x11b8   : > { %p5194_p2 = pnand %p5193_p12, %p5187_p0 }
0x11ba   : > { %5197 = shalt.err (!%p5194_p2)
}
0x11bb   : > { %4303 = dma.vmem_to_hbm [thread:$0]  (%p6664_p5), %s6444_s21, 128, %s6442_s16, %s3532_s5  }
0x11bc PF: > { %s6665_s18 = sld [smem:[#allocation45_spill]]  ;;  %p4400_p7 = scmp.ge.s32.totalorder %s5328_s7, 2 }
0x11bd   : > { %p6666_p1 = scmp.ne.s32.totalorder %s6643_s9, 0 }
0x11bf   : > { %p4362_p8 = pnand %p4400_p7, %p6666_p1 }
0x11c2   : > { %s3559_s26 = sand.u32 1, %s6665_s18  }
0x11c3   : > { %s3560_s8 = scalar_lea.sflag [#allocation6], %s3559_s26 }
0x11c4   : > { %5283 = dma.done.wait (!%p4362_p8), %s3560_s8, 128  }
0x11c5   : > { %5285 = vsyncadd (!%p4362_p8), %s3560_s8, 4294967168  ;;  %s48_s7 = sadd.s32 1, %s5328_s7   ;;  %s6667_s12 = sld [smem:[#allocation46_spill]] }
0x11c6   : > { %p45_p11 = scmp.ge.s32.totalorder %s48_s7, 6   ;;  %s6668_s30 = sld [smem:[#allocation47_spill]] }
0x11c7   : > { %s6669_s25 = smov %s6689_s4  ;;  %s6670_s15 = sld [smem:[#allocation49_spill]] }
0x11c8   : > { %s6671_s5 = sld [smem:[#allocation50_spill]]  ;;  %s6672_s16 = smov %s5999_s24 }
0x11c9   : > { %s6673_s21 = smov %s6683_s1  ;;  %s6675_s24 = smov %s6669_s25 }
0x11ca   : > { %s6677_s1 = smov %s6672_s16  ;;  %s6678_s26 = smov %s5320_s6 }
0x11cb   : > { %s6674_s4 = smov %s6667_s12  ;;  %s6679_s2 = smov %s5324_s27 }
0x11cc   : > { %s6680_s6 = smov %s6673_s21  ;;  %s6681_s27 = smov %s6687_s23 }
0x11cd   : > { %s6676_s25 = smov %s6670_s15  ;;  %47 = sbr.rel (!%p45_p11) target bundleno = 42 (0x2a), region = 230 }
0x11d4   :  { %3565 = vsyncpa [#allocation5], 1 }
0x11d5   :  { %3567 = vsyncpa [#allocation5 + $0x1], 1 }
0x11d6   :  { %3568 = vsyncpa [#allocation8], 1 }
0x11d7   :  { %3569 = vsyncpa [#allocation11], 1 }
0x11d8   :  { %3570 = vsyncpa [#allocation14], 1 }
0x11d9   :  { %3571 = vsyncpa [#allocation17], 1 }
0x11da   :  { %3572 = vsyncpa [#allocation20], 1 }
0x11db   :  { %3573 = vsyncpa [#allocation23], 1 }
0x11dc   :  { %3574 = vsyncpa [#allocation26], 1 }
0x11dd   :  { %3575 = vsyncpa [#allocation29], 1 }
0x11de   :  { %3576 = vsyncpa [#allocation32], 1 }
0x11df   :  { %3577 = vsyncpa [#allocation6], 1 }
0x11e0   :  { %3579 = vsyncpa [#allocation6 + $0x1], 1 }

</bundles_post_ra>
